<compile_context>
chip_gen: v7x
topology: tpu7x:2x2x1
jax: 0.10.0
libtpu: 0.0.40
codegen_flags: <defaults>
</compile_context>

<pallas_src>
import numpy as np

import jax
import jax.numpy as jnp
from jax.experimental import pallas as pl
from jax.experimental.pallas import tpu as pltpu


# ------------------------------ Pallas kernel ------------------------------

def _lenet_kernel(x_ref,
                  w1_ref, b1_ref, ce1_ref, co1_ref,
                  w2_ref, b2_ref, ce2_ref, co2_ref,
                  wf1_ref, bf1_ref, wf2_ref, bf2_ref, wf3_ref, bf3_ref,
                  out_ref):
    tb = x_ref.shape[1]                       # images per grid step (mult of 8)
    x = x_ref[...].astype(jnp.bfloat16)       # (32, tb, 128); lanes = w*3+c

    # ---- conv1: fold the 5 vertical taps into one K=640 GEMM --------------
    # X1 row (i, t) holds image rows i..i+4 side by side in 128-wide slabs.
    x1 = jnp.concatenate([x[ky:ky + 28] for ky in range(5)], axis=-1)
    a1 = jnp.dot(x1.reshape(28 * tb, 640), w1_ref[...],
                 preferred_element_type=jnp.float32)
    a1 = jnp.maximum(a1 + b1_ref[...], 0.0)   # (28*tb, 256); lanes = o1*28+j

    # ---- pool1: rows via outer-axis max (free), cols via 0/1 GEMMs ---------
    a1 = a1.reshape(14, 2, tb, 256)
    r1 = jnp.maximum(a1[:, 0], a1[:, 1]).astype(jnp.bfloat16)
    r1 = r1.reshape(14 * tb, 256)
    p1 = jnp.maximum(
        jnp.dot(r1, ce1_ref[...], preferred_element_type=jnp.float32),
        jnp.dot(r1, co1_ref[...], preferred_element_type=jnp.float32))
    p1 = p1.astype(jnp.bfloat16).reshape(14, tb, 128)   # lanes = o1*14+jj

    # ---- conv2: K=640 folded GEMM ------------------------------------------
    x2 = jnp.concatenate([p1[ky:ky + 10] for ky in range(5)], axis=-1)
    a2 = jnp.dot(x2.reshape(10 * tb, 640), w2_ref[...],
                 preferred_element_type=jnp.float32)
    a2 = jnp.maximum(a2 + b2_ref[...], 0.0)   # (10*tb, 256); lanes = o2*10+j2

    # ---- pool2 --------------------------------------------------------------
    a2 = a2.reshape(5, 2, tb, 256)
    r2 = jnp.maximum(a2[:, 0], a2[:, 1]).astype(jnp.bfloat16)
    r2 = r2.reshape(5 * tb, 256)
    p2 = jnp.maximum(
        jnp.dot(r2, ce2_ref[...], preferred_element_type=jnp.float32),
        jnp.dot(r2, co2_ref[...], preferred_element_type=jnp.float32))
    p2 = p2.astype(jnp.bfloat16).reshape(5, tb, 128)    # lanes = o2*5+jj

    # ---- FC head: three GEMMs with M = tb -----------------------------------
    flat = jnp.concatenate([p2[r] for r in range(5)], axis=-1)   # (tb, 640)
    z1 = jnp.dot(flat, wf1_ref[...], preferred_element_type=jnp.float32)
    z1 = jnp.maximum(z1 + bf1_ref[...], 0.0).astype(jnp.bfloat16)
    z2 = jnp.dot(z1, wf2_ref[...], preferred_element_type=jnp.float32)
    z2 = jnp.maximum(z2 + bf2_ref[...], 0.0).astype(jnp.bfloat16)
    z3 = jnp.dot(z2, wf3_ref[...], preferred_element_type=jnp.float32)
    out_ref[...] = z3 + bf3_ref[...]          # (tb, 128), logits in lanes 0..9


# --------------------------- parameter repacking ---------------------------

def init_params(key):
    """Deterministic PyTorch-shaped params (uniform +/- 1/sqrt(fan_in))."""
    ks = jax.random.split(key, 10)

    def u(k, shape, fan_in):
        bound = float(fan_in) ** -0.5
        return jax.random.uniform(k, shape, jnp.float32, -bound, bound)

    return {
        "conv1_w": u(ks[0], (6, 3, 5, 5), 3 * 25),
        "conv1_b": u(ks[1], (6,), 3 * 25),
        "conv2_w": u(ks[2], (16, 6, 5, 5), 6 * 25),
        "conv2_b": u(ks[3], (16,), 6 * 25),
        "fc1_w":   u(ks[4], (120, 400), 400),
        "fc1_b":   u(ks[5], (120,), 400),
        "fc2_w":   u(ks[6], (84, 120), 120),
        "fc2_b":   u(ks[7], (84,), 120),
        "fc3_w":   u(ks[8], (10, 84), 84),
        "fc3_b":   u(ks[9], (10,), 84),
    }


def prepare_params(params):
    """One-time repack of torch-shaped params into fused-kernel constants."""
    w1t = np.asarray(params["conv1_w"], np.float32)     # (6,3,5,5)
    b1t = np.asarray(params["conv1_b"], np.float32)
    w2t = np.asarray(params["conv2_w"], np.float32)     # (16,6,5,5)
    b2t = np.asarray(params["conv2_b"], np.float32)
    f1w = np.asarray(params["fc1_w"], np.float32)       # (120,400)
    f1b = np.asarray(params["fc1_b"], np.float32)
    f2w = np.asarray(params["fc2_w"], np.float32)       # (84,120)
    f2b = np.asarray(params["fc2_b"], np.float32)
    f3w = np.asarray(params["fc3_w"], np.float32)       # (10,84)
    f3b = np.asarray(params["fc3_b"], np.float32)

    # conv1: K-folded Toeplitz slab.  rows = ky*128 + (j+kx)*3 + c (96 valid
    # per 128-wide tap slab); cols = o1*28 + j (168 valid of 256).
    W1 = np.zeros((640, 256), np.float32)
    for ky in range(5):
        for kx in range(5):
            for j in range(28):
                for o in range(6):
                    for c in range(3):
                        W1[ky * 128 + (j + kx) * 3 + c, o * 28 + j] = \
                            w1t[o, c, ky, kx]
    B1 = np.zeros((1, 256), np.float32)
    for o in range(6):
        B1[0, o * 28:(o + 1) * 28] = b1t[o]

    # pool1 column-compaction 0/1 matrices: lanes (o1,28) -> (o1,14).
    CE1 = np.zeros((256, 128), np.float32)
    CO1 = np.zeros((256, 128), np.float32)
    for o in range(6):
        for jj in range(14):
            CE1[o * 28 + 2 * jj, o * 14 + jj] = 1.0
            CO1[o * 28 + 2 * jj + 1, o * 14 + jj] = 1.0

    # conv2: rows = ky*128 + o1*14 + (j2+kx) (84 valid per slab);
    # cols = o2*10 + j2 (160 valid of 256).
    W2 = np.zeros((640, 256), np.float32)
    for ky in range(5):
        for kx in range(5):
            for j2 in range(10):
                for o2 in range(16):
                    for o1 in range(6):
                        W2[ky * 128 + o1 * 14 + (j2 + kx), o2 * 10 + j2] = \
                            w2t[o2, o1, ky, kx]
    B2 = np.zeros((1, 256), np.float32)
    for o in range(16):
        B2[0, o * 10:(o + 1) * 10] = b2t[o]

    # pool2 column-compaction: lanes (o2,10) -> (o2,5).
    CE2 = np.zeros((256, 128), np.float32)
    CO2 = np.zeros((256, 128), np.float32)
    for o in range(16):
        for jj in range(5):
            CE2[o * 10 + 2 * jj, o * 5 + jj] = 1.0
            CO2[o * 10 + 2 * jj + 1, o * 5 + jj] = 1.0

    # fc1 as a single (640,128) slab; row = r*128 + o2*5 + jj matches the
    # kernel's lane-concat of the 5 pooled rows, value = fc1_w[n, o2*25+r*5+jj]
    # (torch channel-major flatten).
    WF1 = np.zeros((640, 128), np.float32)
    f1r = f1w.reshape(120, 16, 5, 5)                    # [n, c, h, w]
    for r in range(5):
        for o2 in range(16):
            for jj in range(5):
                WF1[r * 128 + o2 * 5 + jj, :120] = f1r[:, o2, r, jj]
    BF1 = np.zeros((1, 128), np.float32)
    BF1[0, :120] = f1b
    WF2 = np.zeros((128, 128), np.float32)
    WF2[:120, :84] = f2w.T
    BF2 = np.zeros((1, 128), np.float32)
    BF2[0, :84] = f2b
    WF3 = np.zeros((128, 128), np.float32)              # lane-dense logits
    WF3[:84, :10] = f3w.T
    BF3 = np.zeros((1, 128), np.float32)
    BF3[0, :10] = f3b

    bf = jnp.bfloat16
    f32 = jnp.float32
    return (jnp.asarray(W1, bf),  jnp.asarray(B1, f32),
            jnp.asarray(CE1, bf), jnp.asarray(CO1, bf),
            jnp.asarray(W2, bf),  jnp.asarray(B2, f32),
            jnp.asarray(CE2, bf), jnp.asarray(CO2, bf),
            jnp.asarray(WF1, bf), jnp.asarray(BF1, f32),
            jnp.asarray(WF2, bf), jnp.asarray(BF2, f32),
            jnp.asarray(WF3, bf), jnp.asarray(BF3, f32))


# ------------------------------ forward pass -------------------------------

def _choose_tile(b):
    """Batch tile (multiple of 8) and padded batch with >= 2 grid steps."""
    tb = 32
    if b < 2 * tb:
        tb = max(8, -(-((b + 1) // 2) // 8) * 8)
    n_tiles = max(2, -(-b // tb))       # >= 2 steps so v7x megacore engages
    return tb, n_tiles * tb


def net_forward(consts, x_nchw):
    """x_nchw: (B, 3, 32, 32) float32 -> logits (B, 10)."""
    b = x_nchw.shape[0]
    # NCHW -> (H=32, B, W*C=96): rows in the leading (outer) dim, images in
    # the sublane dim, (w,c) in lanes.  One fused XLA transpose+pad.
    xp = jnp.transpose(x_nchw.astype(jnp.float32), (2, 0, 3, 1)).reshape(32, b, 96)

    tb, bp = _choose_tile(b)
    xp = jnp.pad(xp, ((0, 0), (0, bp - b), (0, 128 - 96)))   # (32, bp, 128)

    const_specs = [pl.BlockSpec(c.shape, lambda i: (0, 0)) for c in consts]

    out = pl.pallas_call(
        _lenet_kernel,
        out_shape=jax.ShapeDtypeStruct((bp, 128), jnp.float32),
        grid_spec=pltpu.PrefetchScalarGridSpec(
            num_scalar_prefetch=0,
            grid=(bp // tb,),
            in_specs=[pl.BlockSpec((32, tb, 128), lambda i: (0, i, 0))]
                     + const_specs,
            out_specs=pl.BlockSpec((tb, 128), lambda i: (i, 0)),
        ),
        compiler_params=pltpu.CompilerParams(
            dimension_semantics=("parallel",)),
    )(xp, *consts)

    return out[:b, :10]


# --------------------- pure-JAX reference (for checking) -------------------

def _reference_forward(params, x_nchw):
    b = x_nchw.shape[0]
    x = jnp.transpose(x_nchw, (0, 2, 3, 1))            # NHWC

    def conv(xh, w, bias, oh, ow):
        cols = []
        for ky in range(5):
            for kx in range(5):
                cols.append(xh[:, ky:ky + oh, kx:kx + ow, :])
        p = jnp.stack(cols, axis=-1)                   # (B,oh,ow,C,25)
        wr = w.reshape(w.shape[0], w.shape[1], 25)
        y = jnp.einsum("bhwck,ock->bhwo", p, wr, precision="highest")
        return y + bias

    def pool(y):
        bb, h, w_, c = y.shape
        return jnp.max(y.reshape(bb, h // 2, 2, w_ // 2, 2, c), axis=(2, 4))

    y1 = pool(jax.nn.relu(conv(x, params["conv1_w"], params["conv1_b"], 28, 28)))
    y2 = pool(jax.nn.relu(conv(y1, params["conv2_w"], params["conv2_b"], 10, 10)))
    flat = jnp.transpose(y2, (0, 3, 1, 2)).reshape(b, 400)
    z = jax.nn.relu(jnp.dot(flat, params["fc1_w"].T, precision="highest")
                    + params["fc1_b"])
    z = jax.nn.relu(jnp.dot(z, params["fc2_w"].T, precision="highest")
                    + params["fc2_b"])
    return jnp.dot(z, params["fc3_w"].T, precision="highest") + params["fc3_b"]


# ----------------------------------- main -----------------------------------

if __name__ == "__main__":
    key = jax.random.PRNGKey(0)
    pkey, xkey = jax.random.split(key)
    params = init_params(pkey)
    consts = prepare_params(params)          # one-time weight repack (hoisted)

    # fc1's 16*5*5 input implies 32x32 spatial inputs (CIFAR-like).
    x = jax.random.normal(xkey, (2, 3, 32, 32), jnp.float32)

    fwd = jax.jit(net_forward)
    out = jax.block_until_ready(fwd(consts, x))
    assert out.shape == (2, 10) and out.dtype == jnp.float32

    # Sanity-check the fused kernel against a plain-JAX f32 reference of the
    # PyTorch forward (tolerance absorbs bf16 MXU rounding).
    ref = jax.block_until_ready(_reference_forward(params, x))
    maxerr = float(jnp.max(jnp.abs(out - ref)))
    assert maxerr < 5e-2, f"mismatch vs reference: {maxerr}"

    print("KERNEL_OK")
</pallas_src>

<mosaic_0001>
module attributes {stable_mosaic.version = 11 : i64} {
  func.func @_lenet_kernel(%arg0: i32, %arg1: memref<32x8x128xf32, #tpu.memory_space<vmem>>, %arg2: memref<640x256xbf16, #tpu.memory_space<vmem>>, %arg3: memref<1x256xf32, #tpu.memory_space<vmem>>, %arg4: memref<256x128xbf16, #tpu.memory_space<vmem>>, %arg5: memref<256x128xbf16, #tpu.memory_space<vmem>>, %arg6: memref<640x256xbf16, #tpu.memory_space<vmem>>, %arg7: memref<1x256xf32, #tpu.memory_space<vmem>>, %arg8: memref<256x128xbf16, #tpu.memory_space<vmem>>, %arg9: memref<256x128xbf16, #tpu.memory_space<vmem>>, %arg10: memref<640x128xbf16, #tpu.memory_space<vmem>>, %arg11: memref<1x128xf32, #tpu.memory_space<vmem>>, %arg12: memref<128x128xbf16, #tpu.memory_space<vmem>>, %arg13: memref<1x128xf32, #tpu.memory_space<vmem>>, %arg14: memref<128x128xbf16, #tpu.memory_space<vmem>>, %arg15: memref<1x128xf32, #tpu.memory_space<vmem>>, %arg16: memref<8x128xf32, #tpu.memory_space<vmem>>) attributes {dimension_semantics = [#tpu.dimension_semantics<parallel>], iteration_bounds = array<i64: 2>, scalar_prefetch = 0 : i64, scratch_operands = 0 : i64, tpu.core_type = #tpu.core_type<tc>, window_params = [{transform_indices = @transform_0, window_bounds = array<i64: 32, 8, 128>}, {pipeline_mode = #tpu.pipeline_mode<synchronous>, transform_indices = @transform_1, window_bounds = array<i64: 640, 256>}, {pipeline_mode = #tpu.pipeline_mode<synchronous>, transform_indices = @transform_2, window_bounds = array<i64: 1, 256>}, {pipeline_mode = #tpu.pipeline_mode<synchronous>, transform_indices = @transform_3, window_bounds = array<i64: 256, 128>}, {pipeline_mode = #tpu.pipeline_mode<synchronous>, transform_indices = @transform_4, window_bounds = array<i64: 256, 128>}, {pipeline_mode = #tpu.pipeline_mode<synchronous>, transform_indices = @transform_5, window_bounds = array<i64: 640, 256>}, {pipeline_mode = #tpu.pipeline_mode<synchronous>, transform_indices = @transform_6, window_bounds = array<i64: 1, 256>}, {pipeline_mode = #tpu.pipeline_mode<synchronous>, transform_indices = @transform_7, window_bounds = array<i64: 256, 128>}, {pipeline_mode = #tpu.pipeline_mode<synchronous>, transform_indices = @transform_8, window_bounds = array<i64: 256, 128>}, {pipeline_mode = #tpu.pipeline_mode<synchronous>, transform_indices = @transform_9, window_bounds = array<i64: 640, 128>}, {pipeline_mode = #tpu.pipeline_mode<synchronous>, transform_indices = @transform_10, window_bounds = array<i64: 1, 128>}, {pipeline_mode = #tpu.pipeline_mode<synchronous>, transform_indices = @transform_11, window_bounds = array<i64: 128, 128>}, {pipeline_mode = #tpu.pipeline_mode<synchronous>, transform_indices = @transform_12, window_bounds = array<i64: 1, 128>}, {pipeline_mode = #tpu.pipeline_mode<synchronous>, transform_indices = @transform_13, window_bounds = array<i64: 128, 128>}, {pipeline_mode = #tpu.pipeline_mode<synchronous>, transform_indices = @transform_14, window_bounds = array<i64: 1, 128>}, {transform_indices = @transform_15, window_bounds = array<i64: 8, 128>}]} {
    %c0 = arith.constant 0 : index
    %c0_0 = arith.constant 0 : index
    %c0_1 = arith.constant 0 : index
    %0 = vector.load %arg1[%c0, %c0_0, %c0_1] : memref<32x8x128xf32, #tpu.memory_space<vmem>>, vector<32x8x128xf32>
    %1 = arith.truncf %0 : vector<32x8x128xf32> to vector<32x8x128xbf16>
    %2 = vector.extract_strided_slice %1 {offsets = [0, 0, 0], sizes = [28, 8, 128], strides = [1, 1, 1]} : vector<32x8x128xbf16> to vector<28x8x128xbf16>
    %3 = vector.extract_strided_slice %1 {offsets = [1, 0, 0], sizes = [28, 8, 128], strides = [1, 1, 1]} : vector<32x8x128xbf16> to vector<28x8x128xbf16>
    %4 = vector.extract_strided_slice %1 {offsets = [2, 0, 0], sizes = [28, 8, 128], strides = [1, 1, 1]} : vector<32x8x128xbf16> to vector<28x8x128xbf16>
    %5 = vector.extract_strided_slice %1 {offsets = [3, 0, 0], sizes = [28, 8, 128], strides = [1, 1, 1]} : vector<32x8x128xbf16> to vector<28x8x128xbf16>
    %6 = vector.extract_strided_slice %1 {offsets = [4, 0, 0], sizes = [28, 8, 128], strides = [1, 1, 1]} : vector<32x8x128xbf16> to vector<28x8x128xbf16>
    %7 = tpu.concatenate %2, %3, %4, %5, %6 in 2 : vector<28x8x128xbf16>, vector<28x8x128xbf16>, vector<28x8x128xbf16>, vector<28x8x128xbf16>, vector<28x8x128xbf16> -> vector<28x8x640xbf16>
    %8 = vector.shape_cast %7 : vector<28x8x640xbf16> to vector<224x640xbf16>
    %c0_2 = arith.constant 0 : index
    %c0_3 = arith.constant 0 : index
    %9 = vector.load %arg2[%c0_2, %c0_3] : memref<640x256xbf16, #tpu.memory_space<vmem>>, vector<640x256xbf16>
    %cst = arith.constant dense<0.000000e+00> : vector<224x256xf32>
    %10 = tpu.matmul %8, %9, %cst {dimension_numbers = #tpu.dot_dimension_numbers<[1], [0], [0], [1], [0, 0, 1, 1], [], []>} : vector<224x640xbf16>, vector<640x256xbf16>, vector<224x256xf32> -> vector<224x256xf32>
    %c0_4 = arith.constant 0 : index
    %c0_5 = arith.constant 0 : index
    %11 = vector.load %arg3[%c0_4, %c0_5] : memref<1x256xf32, #tpu.memory_space<vmem>>, vector<1x256xf32>
    %12 = vector.broadcast %11 : vector<1x256xf32> to vector<224x256xf32>
    %13 = arith.addf %10, %12 : vector<224x256xf32>
    %cst_6 = arith.constant 0.000000e+00 : f32
    %14 = vector.broadcast %cst_6 : f32 to vector<224x256xf32>
    %15 = arith.maximumf %13, %14 : vector<224x256xf32>
    %16 = vector.shape_cast %15 : vector<224x256xf32> to vector<14x2x8x256xf32>
    %17 = vector.extract_strided_slice %16 {offsets = [0, 0, 0, 0], sizes = [14, 1, 8, 256], strides = [1, 1, 1, 1]} : vector<14x2x8x256xf32> to vector<14x1x8x256xf32>
    %18 = vector.shape_cast %17 : vector<14x1x8x256xf32> to vector<14x8x256xf32>
    %19 = vector.extract_strided_slice %16 {offsets = [0, 1, 0, 0], sizes = [14, 1, 8, 256], strides = [1, 1, 1, 1]} : vector<14x2x8x256xf32> to vector<14x1x8x256xf32>
    %20 = vector.shape_cast %19 : vector<14x1x8x256xf32> to vector<14x8x256xf32>
    %21 = arith.maximumf %18, %20 : vector<14x8x256xf32>
    %22 = arith.truncf %21 : vector<14x8x256xf32> to vector<14x8x256xbf16>
    %23 = vector.shape_cast %22 : vector<14x8x256xbf16> to vector<112x256xbf16>
    %c0_7 = arith.constant 0 : index
    %c0_8 = arith.constant 0 : index
    %24 = vector.load %arg4[%c0_7, %c0_8] : memref<256x128xbf16, #tpu.memory_space<vmem>>, vector<256x128xbf16>
    %cst_9 = arith.constant dense<0.000000e+00> : vector<112x128xf32>
    %25 = tpu.matmul %23, %24, %cst_9 {dimension_numbers = #tpu.dot_dimension_numbers<[1], [0], [0], [1], [0, 0, 1, 1], [], []>} : vector<112x256xbf16>, vector<256x128xbf16>, vector<112x128xf32> -> vector<112x128xf32>
    %c0_10 = arith.constant 0 : index
    %c0_11 = arith.constant 0 : index
    %26 = vector.load %arg5[%c0_10, %c0_11] : memref<256x128xbf16, #tpu.memory_space<vmem>>, vector<256x128xbf16>
    %cst_12 = arith.constant dense<0.000000e+00> : vector<112x128xf32>
    %27 = tpu.matmul %23, %26, %cst_12 {dimension_numbers = #tpu.dot_dimension_numbers<[1], [0], [0], [1], [0, 0, 1, 1], [], []>} : vector<112x256xbf16>, vector<256x128xbf16>, vector<112x128xf32> -> vector<112x128xf32>
    %28 = arith.maximumf %25, %27 : vector<112x128xf32>
    %29 = arith.truncf %28 : vector<112x128xf32> to vector<112x128xbf16>
    %30 = vector.shape_cast %29 : vector<112x128xbf16> to vector<14x8x128xbf16>
    %31 = vector.extract_strided_slice %30 {offsets = [0, 0, 0], sizes = [10, 8, 128], strides = [1, 1, 1]} : vector<14x8x128xbf16> to vector<10x8x128xbf16>
    %32 = vector.extract_strided_slice %30 {offsets = [1, 0, 0], sizes = [10, 8, 128], strides = [1, 1, 1]} : vector<14x8x128xbf16> to vector<10x8x128xbf16>
    %33 = vector.extract_strided_slice %30 {offsets = [2, 0, 0], sizes = [10, 8, 128], strides = [1, 1, 1]} : vector<14x8x128xbf16> to vector<10x8x128xbf16>
    %34 = vector.extract_strided_slice %30 {offsets = [3, 0, 0], sizes = [10, 8, 128], strides = [1, 1, 1]} : vector<14x8x128xbf16> to vector<10x8x128xbf16>
    %35 = vector.extract_strided_slice %30 {offsets = [4, 0, 0], sizes = [10, 8, 128], strides = [1, 1, 1]} : vector<14x8x128xbf16> to vector<10x8x128xbf16>
    %36 = tpu.concatenate %31, %32, %33, %34, %35 in 2 : vector<10x8x128xbf16>, vector<10x8x128xbf16>, vector<10x8x128xbf16>, vector<10x8x128xbf16>, vector<10x8x128xbf16> -> vector<10x8x640xbf16>
    %37 = vector.shape_cast %36 : vector<10x8x640xbf16> to vector<80x640xbf16>
    %c0_13 = arith.constant 0 : index
    %c0_14 = arith.constant 0 : index
    %38 = vector.load %arg6[%c0_13, %c0_14] : memref<640x256xbf16, #tpu.memory_space<vmem>>, vector<640x256xbf16>
    %cst_15 = arith.constant dense<0.000000e+00> : vector<80x256xf32>
    %39 = tpu.matmul %37, %38, %cst_15 {dimension_numbers = #tpu.dot_dimension_numbers<[1], [0], [0], [1], [0, 0, 1, 1], [], []>} : vector<80x640xbf16>, vector<640x256xbf16>, vector<80x256xf32> -> vector<80x256xf32>
    %c0_16 = arith.constant 0 : index
    %c0_17 = arith.constant 0 : index
    %40 = vector.load %arg7[%c0_16, %c0_17] : memref<1x256xf32, #tpu.memory_space<vmem>>, vector<1x256xf32>
    %41 = vector.broadcast %40 : vector<1x256xf32> to vector<80x256xf32>
    %42 = arith.addf %39, %41 : vector<80x256xf32>
    %cst_18 = arith.constant 0.000000e+00 : f32
    %43 = vector.broadcast %cst_18 : f32 to vector<80x256xf32>
    %44 = arith.maximumf %42, %43 : vector<80x256xf32>
    %45 = vector.shape_cast %44 : vector<80x256xf32> to vector<5x2x8x256xf32>
    %46 = vector.extract_strided_slice %45 {offsets = [0, 0, 0, 0], sizes = [5, 1, 8, 256], strides = [1, 1, 1, 1]} : vector<5x2x8x256xf32> to vector<5x1x8x256xf32>
    %47 = vector.shape_cast %46 : vector<5x1x8x256xf32> to vector<5x8x256xf32>
    %48 = vector.extract_strided_slice %45 {offsets = [0, 1, 0, 0], sizes = [5, 1, 8, 256], strides = [1, 1, 1, 1]} : vector<5x2x8x256xf32> to vector<5x1x8x256xf32>
    %49 = vector.shape_cast %48 : vector<5x1x8x256xf32> to vector<5x8x256xf32>
    %50 = arith.maximumf %47, %49 : vector<5x8x256xf32>
    %51 = arith.truncf %50 : vector<5x8x256xf32> to vector<5x8x256xbf16>
    %52 = vector.shape_cast %51 : vector<5x8x256xbf16> to vector<40x256xbf16>
    %c0_19 = arith.constant 0 : index
    %c0_20 = arith.constant 0 : index
    %53 = vector.load %arg8[%c0_19, %c0_20] : memref<256x128xbf16, #tpu.memory_space<vmem>>, vector<256x128xbf16>
    %cst_21 = arith.constant dense<0.000000e+00> : vector<40x128xf32>
    %54 = tpu.matmul %52, %53, %cst_21 {dimension_numbers = #tpu.dot_dimension_numbers<[1], [0], [0], [1], [0, 0, 1, 1], [], []>} : vector<40x256xbf16>, vector<256x128xbf16>, vector<40x128xf32> -> vector<40x128xf32>
    %c0_22 = arith.constant 0 : index
    %c0_23 = arith.constant 0 : index
    %55 = vector.load %arg9[%c0_22, %c0_23] : memref<256x128xbf16, #tpu.memory_space<vmem>>, vector<256x128xbf16>
    %cst_24 = arith.constant dense<0.000000e+00> : vector<40x128xf32>
    %56 = tpu.matmul %52, %55, %cst_24 {dimension_numbers = #tpu.dot_dimension_numbers<[1], [0], [0], [1], [0, 0, 1, 1], [], []>} : vector<40x256xbf16>, vector<256x128xbf16>, vector<40x128xf32> -> vector<40x128xf32>
    %57 = arith.maximumf %54, %56 : vector<40x128xf32>
    %58 = arith.truncf %57 : vector<40x128xf32> to vector<40x128xbf16>
    %59 = vector.shape_cast %58 : vector<40x128xbf16> to vector<5x8x128xbf16>
    %60 = vector.extract_strided_slice %59 {offsets = [0, 0, 0], sizes = [1, 8, 128], strides = [1, 1, 1]} : vector<5x8x128xbf16> to vector<1x8x128xbf16>
    %61 = vector.shape_cast %60 : vector<1x8x128xbf16> to vector<8x128xbf16>
    %62 = vector.extract_strided_slice %59 {offsets = [1, 0, 0], sizes = [1, 8, 128], strides = [1, 1, 1]} : vector<5x8x128xbf16> to vector<1x8x128xbf16>
    %63 = vector.shape_cast %62 : vector<1x8x128xbf16> to vector<8x128xbf16>
    %64 = vector.extract_strided_slice %59 {offsets = [2, 0, 0], sizes = [1, 8, 128], strides = [1, 1, 1]} : vector<5x8x128xbf16> to vector<1x8x128xbf16>
    %65 = vector.shape_cast %64 : vector<1x8x128xbf16> to vector<8x128xbf16>
    %66 = vector.extract_strided_slice %59 {offsets = [3, 0, 0], sizes = [1, 8, 128], strides = [1, 1, 1]} : vector<5x8x128xbf16> to vector<1x8x128xbf16>
    %67 = vector.shape_cast %66 : vector<1x8x128xbf16> to vector<8x128xbf16>
    %68 = vector.extract_strided_slice %59 {offsets = [4, 0, 0], sizes = [1, 8, 128], strides = [1, 1, 1]} : vector<5x8x128xbf16> to vector<1x8x128xbf16>
    %69 = vector.shape_cast %68 : vector<1x8x128xbf16> to vector<8x128xbf16>
    %70 = tpu.concatenate %61, %63, %65, %67, %69 in 1 : vector<8x128xbf16>, vector<8x128xbf16>, vector<8x128xbf16>, vector<8x128xbf16>, vector<8x128xbf16> -> vector<8x640xbf16>
    %c0_25 = arith.constant 0 : index
    %c0_26 = arith.constant 0 : index
    %71 = vector.load %arg10[%c0_25, %c0_26] : memref<640x128xbf16, #tpu.memory_space<vmem>>, vector<640x128xbf16>
    %cst_27 = arith.constant dense<0.000000e+00> : vector<8x128xf32>
    %72 = tpu.matmul %70, %71, %cst_27 {dimension_numbers = #tpu.dot_dimension_numbers<[1], [0], [0], [1], [0, 0, 1, 1], [], []>} : vector<8x640xbf16>, vector<640x128xbf16>, vector<8x128xf32> -> vector<8x128xf32>
    %c0_28 = arith.constant 0 : index
    %c0_29 = arith.constant 0 : index
    %73 = vector.load %arg11[%c0_28, %c0_29] : memref<1x128xf32, #tpu.memory_space<vmem>>, vector<1x128xf32>
    %74 = vector.broadcast %73 : vector<1x128xf32> to vector<8x128xf32>
    %75 = arith.addf %72, %74 : vector<8x128xf32>
    %cst_30 = arith.constant 0.000000e+00 : f32
    %76 = vector.broadcast %cst_30 : f32 to vector<8x128xf32>
    %77 = arith.maximumf %75, %76 : vector<8x128xf32>
    %78 = arith.truncf %77 : vector<8x128xf32> to vector<8x128xbf16>
    %c0_31 = arith.constant 0 : index
    %c0_32 = arith.constant 0 : index
    %79 = vector.load %arg12[%c0_31, %c0_32] : memref<128x128xbf16, #tpu.memory_space<vmem>>, vector<128x128xbf16>
    %cst_33 = arith.constant dense<0.000000e+00> : vector<8x128xf32>
    %80 = tpu.matmul %78, %79, %cst_33 {dimension_numbers = #tpu.dot_dimension_numbers<[1], [0], [0], [1], [0, 0, 1, 1], [], []>} : vector<8x128xbf16>, vector<128x128xbf16>, vector<8x128xf32> -> vector<8x128xf32>
    %c0_34 = arith.constant 0 : index
    %c0_35 = arith.constant 0 : index
    %81 = vector.load %arg13[%c0_34, %c0_35] : memref<1x128xf32, #tpu.memory_space<vmem>>, vector<1x128xf32>
    %82 = vector.broadcast %81 : vector<1x128xf32> to vector<8x128xf32>
    %83 = arith.addf %80, %82 : vector<8x128xf32>
    %cst_36 = arith.constant 0.000000e+00 : f32
    %84 = vector.broadcast %cst_36 : f32 to vector<8x128xf32>
    %85 = arith.maximumf %83, %84 : vector<8x128xf32>
    %86 = arith.truncf %85 : vector<8x128xf32> to vector<8x128xbf16>
    %c0_37 = arith.constant 0 : index
    %c0_38 = arith.constant 0 : index
    %87 = vector.load %arg14[%c0_37, %c0_38] : memref<128x128xbf16, #tpu.memory_space<vmem>>, vector<128x128xbf16>
    %cst_39 = arith.constant dense<0.000000e+00> : vector<8x128xf32>
    %88 = tpu.matmul %86, %87, %cst_39 {dimension_numbers = #tpu.dot_dimension_numbers<[1], [0], [0], [1], [0, 0, 1, 1], [], []>} : vector<8x128xbf16>, vector<128x128xbf16>, vector<8x128xf32> -> vector<8x128xf32>
    %c0_40 = arith.constant 0 : index
    %c0_41 = arith.constant 0 : index
    %89 = vector.load %arg15[%c0_40, %c0_41] : memref<1x128xf32, #tpu.memory_space<vmem>>, vector<1x128xf32>
    %90 = vector.broadcast %89 : vector<1x128xf32> to vector<8x128xf32>
    %91 = arith.addf %88, %90 : vector<8x128xf32>
    %c0_42 = arith.constant 0 : index
    %c0_43 = arith.constant 0 : index
    %92 = vector.load %arg16[%c0_42, %c0_43] : memref<8x128xf32, #tpu.memory_space<vmem>>, vector<8x128xf32>
    tpu.vector_store %arg16[%c0_42, %c0_43], %91 {strides = array<i32>} : memref<8x128xf32, #tpu.memory_space<vmem>>, vector<8x128xf32>,
    return
  }
  func.func @transform_0(%arg0: i32) -> (i32, i32, i32) {
    %c0_i32 = arith.constant 0 : i32
    %c0_i32_0 = arith.constant 0 : i32
    %c0_i32_1 = arith.constant 0 : i32
    return %c0_i32, %arg0, %c0_i32_0 : i32, i32, i32
  }
  func.func @transform_1(%arg0: i32) -> (i32, i32) {
    %c0_i32 = arith.constant 0 : i32
    %c0_i32_0 = arith.constant 0 : i32
    %c0_i32_1 = arith.constant 0 : i32
    return %c0_i32, %c0_i32_0 : i32, i32
  }
  func.func @transform_2(%arg0: i32) -> (i32, i32) {
    %c0_i32 = arith.constant 0 : i32
    %c0_i32_0 = arith.constant 0 : i32
    %c0_i32_1 = arith.constant 0 : i32
    return %c0_i32, %c0_i32_0 : i32, i32
  }
  func.func @transform_3(%arg0: i32) -> (i32, i32) {
    %c0_i32 = arith.constant 0 : i32
    %c0_i32_0 = arith.constant 0 : i32
    %c0_i32_1 = arith.constant 0 : i32
    return %c0_i32, %c0_i32_0 : i32, i32
  }
  func.func @transform_4(%arg0: i32) -> (i32, i32) {
    %c0_i32 = arith.constant 0 : i32
    %c0_i32_0 = arith.constant 0 : i32
    %c0_i32_1 = arith.constant 0 : i32
    return %c0_i32, %c0_i32_0 : i32, i32
  }
  func.func @transform_5(%arg0: i32) -> (i32, i32) {
    %c0_i32 = arith.constant 0 : i32
    %c0_i32_0 = arith.constant 0 : i32
    %c0_i32_1 = arith.constant 0 : i32
    return %c0_i32, %c0_i32_0 : i32, i32
  }
  func.func @transform_6(%arg0: i32) -> (i32, i32) {
    %c0_i32 = arith.constant 0 : i32
    %c0_i32_0 = arith.constant 0 : i32
    %c0_i32_1 = arith.constant 0 : i32
    return %c0_i32, %c0_i32_0 : i32, i32
  }
  func.func @transform_7(%arg0: i32) -> (i32, i32) {
    %c0_i32 = arith.constant 0 : i32
    %c0_i32_0 = arith.constant 0 : i32
    %c0_i32_1 = arith.constant 0 : i32
    return %c0_i32, %c0_i32_0 : i32, i32
  }
  func.func @transform_8(%arg0: i32) -> (i32, i32) {
    %c0_i32 = arith.constant 0 : i32
    %c0_i32_0 = arith.constant 0 : i32
    %c0_i32_1 = arith.constant 0 : i32
    return %c0_i32, %c0_i32_0 : i32, i32
  }
  func.func @transform_9(%arg0: i32) -> (i32, i32) {
    %c0_i32 = arith.constant 0 : i32
    %c0_i32_0 = arith.constant 0 : i32
    %c0_i32_1 = arith.constant 0 : i32
    return %c0_i32, %c0_i32_0 : i32, i32
  }
  func.func @transform_10(%arg0: i32) -> (i32, i32) {
    %c0_i32 = arith.constant 0 : i32
    %c0_i32_0 = arith.constant 0 : i32
    %c0_i32_1 = arith.constant 0 : i32
    return %c0_i32, %c0_i32_0 : i32, i32
  }
  func.func @transform_11(%arg0: i32) -> (i32, i32) {
    %c0_i32 = arith.constant 0 : i32
    %c0_i32_0 = arith.constant 0 : i32
    %c0_i32_1 = arith.constant 0 : i32
    return %c0_i32, %c0_i32_0 : i32, i32
  }
  func.func @transform_12(%arg0: i32) -> (i32, i32) {
    %c0_i32 = arith.constant 0 : i32
    %c0_i32_0 = arith.constant 0 : i32
    %c0_i32_1 = arith.constant 0 : i32
    return %c0_i32, %c0_i32_0 : i32, i32
  }
  func.func @transform_13(%arg0: i32) -> (i32, i32) {
    %c0_i32 = arith.constant 0 : i32
    %c0_i32_0 = arith.constant 0 : i32
    %c0_i32_1 = arith.constant 0 : i32
    return %c0_i32, %c0_i32_0 : i32, i32
  }
  func.func @transform_14(%arg0: i32) -> (i32, i32) {
    %c0_i32 = arith.constant 0 : i32
    %c0_i32_0 = arith.constant 0 : i32
    %c0_i32_1 = arith.constant 0 : i32
    return %c0_i32, %c0_i32_0 : i32, i32
  }
  func.func @transform_15(%arg0: i32) -> (i32, i32) {
    %c0_i32 = arith.constant 0 : i32
    %c0_i32_0 = arith.constant 0 : i32
    return %arg0, %c0_i32 : i32, i32
  }
}

</mosaic_0001>

<bundles_post_ra>
// kernel: net_forward.1
= control target key start
LH: loop header
LB: loop body
LE: loop exit
PB: predicated region body
PF: predicated region fallthrough
CT: control target
= control target key end

     0   :  { %s7450_s0 = inlined_call_operand.vmem [shape: f32[32,16,128], index: 0, kind: input, shape index: {}]   ;;  %s7451_s1 = inlined_call_operand.vmem [shape: bf16[640,256], index: 1, kind: input, shape index: {}]   ;;  %s7452_s2 = inlined_call_operand.vmem [shape: f32[1,256], index: 2, kind: input, shape index: {}]   ;;  %s7453_s3 = inlined_call_operand.vmem [shape: bf16[256,128], index: 3, kind: input, shape index: {}]   ;;  %s7454_s4 = inlined_call_operand.vmem [shape: bf16[256,128], index: 4, kind: input, shape index: {}]   ;;  %s7455_s5 = inlined_call_operand.hbm [shape: bf16[640,256], index: 5, kind: input, shape index: {}]   ;;  %s7456_s6 = inlined_call_operand.vmem [shape: f32[1,256], index: 6, kind: input, shape index: {}]   ;;  %s7457_s7 = inlined_call_operand.hbm [shape: bf16[256,128], index: 7, kind: input, shape index: {}]   ;;  %s7458_s8 = inlined_call_operand.hbm [shape: bf16[256,128], index: 8, kind: input, shape index: {}]   ;;  %s7459_s9 = inlined_call_operand.vmem [shape: bf16[640,128], index: 9, kind: input, shape index: {}]   ;;  %s7460_s10 = inlined_call_operand.vmem [shape: f32[1,128], index: 10, kind: input, shape index: {}]   ;;  %s7461_s11 = inlined_call_operand.hbm [shape: bf16[128,128], index: 11, kind: input, shape index: {}]   ;;  %s7462_s12 = inlined_call_operand.vmem [shape: f32[1,128], index: 12, kind: input, shape index: {}]   ;;  %s7463_s13 = inlined_call_operand.hbm [shape: bf16[128,128], index: 13, kind: input, shape index: {}]   ;;  %s7464_s14 = inlined_call_operand.vmem [shape: f32[1,128], index: 14, kind: input, shape index: {}]   ;;  %s7465_s15 = inlined_call_operand.vmem [shape: f32[16,128], index: 15, kind: output, shape index: {}]  }
   0x1   :  { %7475 = sst [smem:[#allocation16_spill]] %s7452_s2 }
   0x2   :  { %7476 = sst [smem:[#allocation17_spill]] %s7456_s6 }
   0x3   :  { %7477 = sst [smem:[#allocation18_spill]] %s7457_s7 }
   0x4   :  { %7478 = sst [smem:[#allocation19_spill]] %s7459_s9 }
   0x5   :  { %7479 = sst [smem:[#allocation20_spill]] %s7460_s10 }
   0x6   :  { %7480 = sst [smem:[#allocation21_spill]] %s7461_s11 }
   0x7   :  { %7481 = sst [smem:[#allocation22_spill]] %s7462_s12 }
   0x8   :  { %7482 = sst [smem:[#allocation23_spill]] %s7464_s14 }
   0x9   :  { %7483 = sst [smem:[#allocation24_spill]] %s7465_s15 }
   0xa   :  { %20 = vsyncpa [#allocation4], 0 }
   0xb   :  { %21 = vsyncpa [#allocation6], 0 }
   0xc   :  { %22 = vsyncpa [#allocation9], 0  ;;  %s6283_s18 = smov 0   ;;  %s6285_s19 = smov 0  }
   0xd   :  { %s6287_s20 = smov 0  }
   0xe LB: > { %s6299_s21 = sadd.s32 4294967295, %s6189_s20   ;;  %s6302_s22 = sadd.s32 1, %s6189_s20   ;;  %s6189_s20 = sphi %s6287_s20, %s7509_s20   ;;  %s6185_s19 = sphi %s6285_s19, %s7512_s19   ;;  %s6181_s18 = sphi %s6283_s18, %s7511_s18  }
   0xf   : > { %7484 = sst [smem:[#allocation14_spill]] %s6302_s22  ;;  %s32_s23 = ssub.s32 %s6189_s20, %s6302_s22 }
  0x10   : > { %s35_s24 = sadd.s32 1, %s6185_s19  ;;  %p33_p0 = scmp.eq.s32.totalorder %s32_s23, 0 }
  0x11   : > { %p42_p1 = scmp.ne.s32.totalorder %s6185_s19, %s6181_s18  ;;  %p43_p2 = scmp.eq.s32.totalorder %s6189_s20, 0 }
  0x12   : > { %p4616_p3 = scmp.ge.s32.totalorder %s6189_s20, 1  ;;  %p379_p5 = scmp.lt.s32.totalorder %s6189_s20, 3 }
  0x13   : > { %s6312_s25 = scalar_select %p33_p0, %s6185_s19, %s35_s24  }
  0x14   : > { %p6314_p4 = por %p43_p2, %p42_p1  ;;  %p7468_p6 = scmp.eq.s32.totalorder %s6299_s21, 0 }
  0x15   : > { %7485 = sst [smem:[#allocation15_spill]] %s6312_s25  ;;  %p6320_p7 = pnand %p4616_p3, %p379_p5 }
  0x16   : > { %s7486_s26 = scalar_select %p6314_p4, 1, 0 }
  0x17   : > { %s7487_s27 = scalar_select %p6320_p7, 1, 0 }
  0x18   : > { %s6191_s28 = smov [#allocation5]   ;;  %p5593_p8 = pneg %p6320_p7 }
  0x19   : > { %s419_s29 = sshll.u32 %s6191_s28, 4  ;;  %s6192_s16 = smov [#allocation8]   ;;  %s6326_s29 = int_to_ptr.vmem [resolvable:$true] %s419_s29 }
  0x1a   : > { %p6330_p9 = pnand %p7468_p6, %p5593_p8  ;;  %s451_s17 = sshll.u32 %s6192_s16, 4  ;;  %s6334_s17 = int_to_ptr.vmem [resolvable:$true] %s451_s17 }
  0x1b   : > { %s6193_s23 = smov [#allocation3]   ;;  %s7489_s7 = sld [smem:[#allocation18_spill]] }
  0x1c   : > { %s6336_s24 = sshll.u32 %s6193_s23, 4  ;;  %p6346_p11 = pneg %p6330_p9  ;;  %s404_s24 = int_to_ptr.vmem [resolvable:$true] %s6336_s24 }
  0x21   : > { %s6015_s28 = scalar_lea.hbm %s7489_s7, 2048 }
  0x22   : > { %p6016_p10 = scmp.ne.s32.totalorder %s7489_s7, %s6015_s28  ;;  %p6022_p0 = scmp.lt.u32.totalorder %s6015_s28, %s7489_s7 }
  0x24   : > { %p6018_p12 = pnand %p6346_p11, %p6016_p10 }
  0x26   : > { %p6019_p13 = pneg %p6018_p12 }
  0x28   : > { %p6024_p1 = pnand %p6022_p0, %p6019_p13 }
  0x2a   : > { %6027 = shalt.err (!%p6024_p1)
}
  0x2b   : > { %s6028_s14 = scalar_lea.vmem %s6326_s29, 2048  ;;  %p6036_p8 = scmp.lt.s32.totalorder %s6326_s29, %s6326_s29 }
  0x2c   : > { %p6029_p2 = scmp.ne.s32.totalorder %s6326_s29, %s6028_s14  ;;  %p6037_p6 = scmp.lt.s32.totalorder %s6028_s14, %s6028_s14 }
  0x2e   : > { %p6031_p3 = pnand %p6029_p2, %p6346_p11  ;;  %p6038_p10 = por %p6037_p6, %p6036_p8 }
  0x30   : > { %p6032_p5 = pneg %p6031_p3 }
  0x32   : > { %p6039_p12 = pnand %p6038_p10, %p6032_p5 }
  0x34   : > { %6042 = shalt.err (!%p6039_p12)
}
  0x35   : > { %s7471_s15 = smov 64   ;;  %s7473_s22 = smov 4  }
  0x36   : > { %5599 = dma.hbm_to_vmem [thread:$0]  (!%p6330_p9), %s7489_s7, 2048, %s6326_s29, [#allocation6], %s7471_s15, %s7471_s15, %s7473_s22  }
  0x37   : > { %s7491_s11 = sld [smem:[#allocation21_spill]] }
  0x3d   : > { %s6043_s14 = scalar_lea.hbm %s7491_s11, 1024 }
  0x3e   : > { %p6044_p6 = scmp.ne.s32.totalorder %s7491_s11, %s6043_s14  ;;  %p6050_p1 = scmp.lt.u32.totalorder %s6043_s14, %s7491_s11 }
  0x40   : > { %p6046_p13 = pnand %p6044_p6, %p6346_p11 }
  0x42   : > { %p6047_p0 = pneg %p6046_p13 }
  0x44   : > { %p6052_p2 = pnand %p6050_p1, %p6047_p0 }
  0x46   : > { %6055 = shalt.err (!%p6052_p2)
}
  0x47   : > { %s6056_s29 = scalar_lea.vmem %s6334_s17, 1024  ;;  %p6064_p10 = scmp.lt.s32.totalorder %s6334_s17, %s6334_s17 }
  0x48   : > { %p6057_p3 = scmp.ne.s32.totalorder %s6334_s17, %s6056_s29  ;;  %p6065_p12 = scmp.lt.s32.totalorder %s6056_s29, %s6056_s29 }
  0x4a   : > { %p6059_p5 = pnand %p6057_p3, %p6346_p11  ;;  %p6066_p6 = por %p6065_p12, %p6064_p10 }
  0x4c   : > { %p6060_p8 = pneg %p6059_p5 }
  0x4e   : > { %p6067_p13 = pnand %p6066_p6, %p6060_p8 }
  0x50   : > { %6070 = shalt.err (!%p6067_p13)
}
  0x51   : > { %5605 = dma.hbm_to_vmem [thread:$0]  (!%p6330_p9), %s7491_s11, 1024, %s6334_s17, [#allocation9], %s7471_s15, %s7471_s15, %s7473_s22  }
  0x52   : > { %s6071_s25 = scalar_lea.hbm %s7455_s5, 10240 }
  0x53   : > { %p6072_p0 = scmp.ne.s32.totalorder %s7455_s5, %s6071_s25  ;;  %p6078_p3 = scmp.lt.u32.totalorder %s6071_s25, %s7455_s5 }
  0x55   : > { %p6074_p1 = pnand %p6072_p0, %p6346_p11 }
  0x57   : > { %p6075_p2 = pneg %p6074_p1 }
  0x59   : > { %p6080_p5 = pnand %p6078_p3, %p6075_p2 }
  0x5b   : > { %6083 = shalt.err (!%p6080_p5)
}
  0x5c   : > { %s6084_s29 = scalar_lea.vmem %s404_s24, 10240  ;;  %p6092_p6 = scmp.lt.s32.totalorder %s404_s24, %s404_s24 }
  0x5d   : > { %p6085_p8 = scmp.ne.s32.totalorder %s404_s24, %s6084_s29  ;;  %p6093_p13 = scmp.lt.s32.totalorder %s6084_s29, %s6084_s29 }
  0x5f   : > { %p6087_p10 = pnand %p6085_p8, %p6346_p11  ;;  %p6094_p7 = por %p6093_p13, %p6092_p6 }
  0x61   : > { %p6088_p12 = pneg %p6087_p10 }
  0x63   : > { %p6095_p4 = pnand %p6094_p7, %p6088_p12 }
  0x65   : > { %6098 = shalt.err (!%p6095_p4)
}
  0x66   : > { %s6196_s17 = smov 128   ;;  %s6197_s2 = smov 8  }
  0x67   : > { %5596 = dma.hbm_to_vmem [thread:$0]  (!%p6330_p9), %s7455_s5, 10240, %s404_s24, [#allocation4], %s6196_s17, %s6196_s17, %s6197_s2  }
  0x68   : > { %s6198_s10 = smov [#allocation7]   ;;  %s6199_s28 = smov [#allocation10]  }
  0x69   : > { %s432_s25 = sshll.u32 %s6198_s10, 4  ;;  %s467_s16 = sshll.u32 %s6199_s28, 4  ;;  %s433_s25 = int_to_ptr.vmem [resolvable:$true] %s432_s25  ;;  %s468_s16 = int_to_ptr.vmem [resolvable:$true] %s467_s16 }
  0x6a   : > { %s6099_s29 = scalar_lea.hbm %s7458_s8, 2048 }
  0x6b   : > { %p6100_p4 = scmp.ne.s32.totalorder %s7458_s8, %s6099_s29  ;;  %p6106_p1 = scmp.lt.u32.totalorder %s6099_s29, %s7458_s8 }
  0x6d   : > { %p6102_p7 = pnand %p6100_p4, %p6346_p11 }
  0x6f   : > { %p6103_p0 = pneg %p6102_p7 }
  0x71   : > { %p6108_p2 = pnand %p6106_p1, %p6103_p0 }
  0x73   : > { %6111 = shalt.err (!%p6108_p2)
}
  0x74   : > { %s6112_s24 = scalar_lea.vmem %s433_s25, 2048  ;;  %p6120_p10 = scmp.lt.s32.totalorder %s433_s25, %s433_s25 }
  0x75   : > { %p6113_p3 = scmp.ne.s32.totalorder %s433_s25, %s6112_s24  ;;  %p6121_p12 = scmp.lt.s32.totalorder %s6112_s24, %s6112_s24 }
  0x77   : > { %p6115_p5 = pnand %p6113_p3, %p6346_p11  ;;  %p6122_p6 = por %p6121_p12, %p6120_p10 }
  0x79   : > { %p6116_p8 = pneg %p6115_p5 }
  0x7b   : > { %p6123_p13 = pnand %p6122_p6, %p6116_p8 }
  0x7d   : > { %6126 = shalt.err (!%p6123_p13)
}
  0x7e   : > { %s7492_s15 = smov 4   ;;  %s7493_s22 = smov 64  }
  0x7f   : > { %5602 = dma.hbm_to_vmem [thread:$0]  (!%p6330_p9), %s7458_s8, 2048, %s433_s25, [#allocation6], %s7493_s22, %s7493_s22, %s7492_s15  }
  0x80   : > { %s6127_s6 = scalar_lea.hbm %s7463_s13, 1024 }
  0x81   : > { %p6128_p4 = scmp.ne.s32.totalorder %s7463_s13, %s6127_s6  ;;  %p6134_p1 = scmp.lt.u32.totalorder %s6127_s6, %s7463_s13 }
  0x83   : > { %p6130_p7 = pnand %p6128_p4, %p6346_p11 }
  0x85   : > { %p6131_p0 = pneg %p6130_p7 }
  0x87   : > { %p6136_p2 = pnand %p6134_p1, %p6131_p0 }
  0x89   : > { %6139 = shalt.err (!%p6136_p2)
}
  0x8a   : > { %s6140_s14 = scalar_lea.vmem %s468_s16, 1024  ;;  %p6148_p10 = scmp.lt.s32.totalorder %s468_s16, %s468_s16 }
  0x8b   : > { %p6141_p3 = scmp.ne.s32.totalorder %s468_s16, %s6140_s14  ;;  %p6149_p12 = scmp.lt.s32.totalorder %s6140_s14, %s6140_s14 }
  0x8d   : > { %p6143_p5 = pnand %p6141_p3, %p6346_p11  ;;  %p6150_p6 = por %p6149_p12, %p6148_p10 }
  0x8f   : > { %p6144_p8 = pneg %p6143_p5 }
  0x91   : > { %p6151_p13 = pnand %p6150_p6, %p6144_p8 }
  0x93   : > { %6154 = shalt.err (!%p6151_p13)
}
  0x94   : > { %5608 = dma.hbm_to_vmem [thread:$0]  (!%p6330_p9), %s7463_s13, 1024, %s468_s16, [#allocation9], %s7493_s22, %s7493_s22, %s7492_s15  }
  0x95   : > { %p4622_p4 = scmp.ge.s32.totalorder %s6189_s20, 2 }
  0x96   : > { %p7494_p11 = scmp.ne.s32.totalorder (!%p4622_p4), %s7486_s26, 0 }
  0x97   : > { %480 = sbr.rel (%p4622_p4) target bundleno = 178 (0xb2), region = 72 }
  0x9e   : > { %483 = sbr.rel (!%p7494_p11) target bundleno = 178 (0xb2), region = 76  ;;  %s485_s12 = sand.u32 (%p7494_p11), 1, %s6185_s19  }
  0x9f   : > { %s4624_s24 = sshll.u32 (%p7494_p11), %s6189_s20, 3  ;;  %s4623_s7 = sshll.u32 (%p7494_p11), %s485_s12, 8 }
  0xa0   : > { %s6465_s17 = scalar_lea.vmem (%p7494_p11), %s7450_s0, %s4624_s24  ;;  %s6470_s26 = scalar_lea.vmem (%p7494_p11), [#allocation2], %s4623_s7 }
  0xa1   : > { %v579_v0 = vld [vmem:[%s6465_s17] sm:$0xff] (%p7494_p11)  ;;  %v581_v1 = vld [vmem:[%s6465_s17 + $0x10] sm:$0xff] (%p7494_p11) }
  0xa2   : > { %v583_v2 = vld [vmem:[%s6465_s17 + $0x20] sm:$0xff] (%p7494_p11)  ;;  %580 = vst [vmem:[%s6470_s26] sm:$0xff] (%p7494_p11), %v579_v0  ;;  %582 = vst [vmem:[%s6470_s26 + $0x8] sm:$0xff] (%p7494_p11), %v581_v1  ;;  %v585_v3 = vld [vmem:[%s6465_s17 + $0x30] sm:$0xff] (%p7494_p11) }
  0xa3   : > { %584 = vst [vmem:[%s6470_s26 + $0x10] sm:$0xff] (%p7494_p11), %v583_v2  ;;  %v587_v4 = vld [vmem:[%s6465_s17 + $0x40] sm:$0xff] (%p7494_p11)  ;;  %v589_v5 = vld [vmem:[%s6465_s17 + $0x50] sm:$0xff] (%p7494_p11)  ;;  %586 = vst [vmem:[%s6470_s26 + $0x18] sm:$0xff] (%p7494_p11), %v585_v3 }
  0xa4   : > { %588 = vst [vmem:[%s6470_s26 + $0x20] sm:$0xff] (%p7494_p11), %v587_v4  ;;  %590 = vst [vmem:[%s6470_s26 + $0x28] sm:$0xff] (%p7494_p11), %v589_v5  ;;  %v591_v6 = vld [vmem:[%s6465_s17 + $0x60] sm:$0xff] (%p7494_p11)  ;;  %v593_v7 = vld [vmem:[%s6465_s17 + $0x70] sm:$0xff] (%p7494_p11) }
  0xa5   : > { %v595_v8 = vld [vmem:[%s6465_s17 + $0x80] sm:$0xff]  ;;  %592 = vst [vmem:[%s6470_s26 + $0x30] sm:$0xff] %v591_v6  ;;  %594 = vst [vmem:[%s6470_s26 + $0x38] sm:$0xff] %v593_v7  ;;  %v597_v9 = vld [vmem:[%s6465_s17 + $0x90] sm:$0xff] }
  0xa6   : > { %596 = vst [vmem:[%s6470_s26 + $0x40] sm:$0xff] %v595_v8  ;;  %v599_v10 = vld [vmem:[%s6465_s17 + $0xa0] sm:$0xff]  ;;  %v601_v11 = vld [vmem:[%s6465_s17 + $0xb0] sm:$0xff]  ;;  %598 = vst [vmem:[%s6470_s26 + $0x48] sm:$0xff] %v597_v9 }
  0xa7   : > { %600 = vst [vmem:[%s6470_s26 + $0x50] sm:$0xff] %v599_v10  ;;  %602 = vst [vmem:[%s6470_s26 + $0x58] sm:$0xff] %v601_v11  ;;  %v603_v12 = vld [vmem:[%s6465_s17 + $0xc0] sm:$0xff]  ;;  %v605_v13 = vld [vmem:[%s6465_s17 + $0xd0] sm:$0xff] }
  0xa8   : > { %v607_v14 = vld [vmem:[%s6465_s17 + $0xe0] sm:$0xff]  ;;  %604 = vst [vmem:[%s6470_s26 + $0x60] sm:$0xff] %v603_v12  ;;  %606 = vst [vmem:[%s6470_s26 + $0x68] sm:$0xff] %v605_v13  ;;  %v609_v15 = vld [vmem:[%s6465_s17 + $0xf0] sm:$0xff] }
  0xa9   : > { %608 = vst [vmem:[%s6470_s26 + $0x70] sm:$0xff] %v607_v14  ;;  %v611_v16 = vld [vmem:[%s6465_s17 + $0x100] sm:$0xff]  ;;  %v613_v17 = vld [vmem:[%s6465_s17 + $0x110] sm:$0xff]  ;;  %610 = vst [vmem:[%s6470_s26 + $0x78] sm:$0xff] %v609_v15 }
  0xaa   : > { %612 = vst [vmem:[%s6470_s26 + $0x80] sm:$0xff] %v611_v16  ;;  %614 = vst [vmem:[%s6470_s26 + $0x88] sm:$0xff] %v613_v17  ;;  %v615_v18 = vld [vmem:[%s6465_s17 + $0x120] sm:$0xff]  ;;  %v617_v19 = vld [vmem:[%s6465_s17 + $0x130] sm:$0xff] }
  0xab   : > { %v619_v20 = vld [vmem:[%s6465_s17 + $0x140] sm:$0xff]  ;;  %616 = vst [vmem:[%s6470_s26 + $0x90] sm:$0xff] %v615_v18  ;;  %618 = vst [vmem:[%s6470_s26 + $0x98] sm:$0xff] %v617_v19  ;;  %v621_v21 = vld [vmem:[%s6465_s17 + $0x150] sm:$0xff] }
  0xac   : > { %620 = vst [vmem:[%s6470_s26 + $0xa0] sm:$0xff] %v619_v20  ;;  %v623_v22 = vld [vmem:[%s6465_s17 + $0x160] sm:$0xff]  ;;  %v625_v23 = vld [vmem:[%s6465_s17 + $0x170] sm:$0xff]  ;;  %622 = vst [vmem:[%s6470_s26 + $0xa8] sm:$0xff] %v621_v21 }
  0xad   : > { %624 = vst [vmem:[%s6470_s26 + $0xb0] sm:$0xff] %v623_v22  ;;  %626 = vst [vmem:[%s6470_s26 + $0xb8] sm:$0xff] %v625_v23  ;;  %v627_v24 = vld [vmem:[%s6465_s17 + $0x180] sm:$0xff]  ;;  %v629_v25 = vld [vmem:[%s6465_s17 + $0x190] sm:$0xff] }
  0xae   : > { %v631_v26 = vld [vmem:[%s6465_s17 + $0x1a0] sm:$0xff]  ;;  %628 = vst [vmem:[%s6470_s26 + $0xc0] sm:$0xff] %v627_v24  ;;  %630 = vst [vmem:[%s6470_s26 + $0xc8] sm:$0xff] %v629_v25  ;;  %v633_v27 = vld [vmem:[%s6465_s17 + $0x1b0] sm:$0xff] }
  0xaf   : > { %632 = vst [vmem:[%s6470_s26 + $0xd0] sm:$0xff] %v631_v26  ;;  %v635_v28 = vld [vmem:[%s6465_s17 + $0x1c0] sm:$0xff]  ;;  %v637_v29 = vld [vmem:[%s6465_s17 + $0x1d0] sm:$0xff]  ;;  %634 = vst [vmem:[%s6470_s26 + $0xd8] sm:$0xff] %v633_v27 }
  0xb0   : > { %636 = vst [vmem:[%s6470_s26 + $0xe0] sm:$0xff] %v635_v28  ;;  %638 = vst [vmem:[%s6470_s26 + $0xe8] sm:$0xff] %v637_v29  ;;  %v639_v30 = vld [vmem:[%s6465_s17 + $0x1e0] sm:$0xff]  ;;  %v641_v31 = vld [vmem:[%s6465_s17 + $0x1f0] sm:$0xff] }
  0xb1   : > { %640 = vst [vmem:[%s6470_s26 + $0xf0] sm:$0xff] %v639_v30  ;;  %642 = vst [vmem:[%s6470_s26 + $0xf8] sm:$0xff] %v641_v31 }
  0xb2 PF: > { %p7495_p9 = scmp.ne.s32.totalorder %s7487_s27, 0 }
  0xb3   : > { %s654_s20 = sand.u32 (!%p7495_p9), 1, %s6181_s18   ;;  %p7496_p7 = scmp.eq.s32.totalorder (!%p7495_p9), %s6299_s21, 0 }
  0xb4   : > { %651 = sbr.rel (%p7495_p9) target bundleno = 2332 (0x91c), region = 114  ;;  %s4626_s16 = sshll.u32 (!%p7495_p9), %s654_s20, 8 }
  0xb5   : > { %s6536_s15 = scalar_lea.vmem (!%p7495_p9), [#allocation2], %s4626_s16 }
  0xbb   : > { %6168 = dma.done.wait (%p7496_p7), [#allocation4], 10240   ;;  %p7497_p0 = pmov %p7496_p7 }
  0xbd   : > { %6170 = vsyncadd (%p7497_p0), [#allocation4], 4294957056  ;;  %p7498_p1 = pmov %p7497_p0 }
  0xbe   : > { %p7499_p2 = pmov %p7497_p0 }
  0xbf   : > { %6172 = dma.done.wait (%p7498_p1), [#allocation6], 4096  }
  0xc0   : > { %6174 = vsyncadd (%p7499_p2), [#allocation6], 4294963200  ;;  %p7500_p3 = pmov %p7497_p0 }
  0xc1   : > { %p7501_p5 = pmov %p7497_p0 }
  0xc2   : > { %6176 = dma.done.wait (%p7500_p3), [#allocation9], 2048  }
  0xc3   : > { %6178 = vsyncadd (%p7501_p5), [#allocation9], 4294965248  ;;  %v5655_v32 = vld [vmem:[%s7451_s1 + $0x4] ss:$8 sps:$4 sm:$0xff]   ;;  %v5657_v33 = vld [vmem:[%s7451_s1] ss:$8 sps:$4 sm:$0xff]  }
  0xc4   : > { %1407 = vmatprep.subr.bf16.mxu0 %v5655_v32  ;;  %v5658_v34 = vld [vmem:[%s7451_s1 + $0x14] ss:$8 sps:$4 sm:$0xff]   ;;  %v5660_v35 = vld [vmem:[%s7451_s1 + $0x10] ss:$8 sps:$4 sm:$0xff]   ;;  %v5661_v36 = vld [vmem:[%s7451_s1 + $0x24] ss:$8 sps:$4 sm:$0xff]  }
  0xc5   : > { %1408 = vmatpush1.bf16.msra.mxu0 %v5657_v33  ;;  %v5663_v37 = vld [vmem:[%s7451_s1 + $0x20] ss:$8 sps:$4 sm:$0xff]   ;;  %v5664_v38 = vld [vmem:[%s7451_s1 + $0x34] ss:$8 sps:$4 sm:$0xff]   ;;  %v5666_v39 = vld [vmem:[%s7451_s1 + $0x30] ss:$8 sps:$4 sm:$0xff]  }
  0xc6   : > { %1409 = vmatprep.subr.bf16.mxu0 %v5658_v34  ;;  %v5667_v40 = vld [vmem:[%s7451_s1 + $0x44] ss:$8 sps:$4 sm:$0xff]   ;;  %v5669_v41 = vld [vmem:[%s7451_s1 + $0x40] ss:$8 sps:$4 sm:$0xff]   ;;  %v5670_v42 = vld [vmem:[%s7451_s1 + $0x54] ss:$8 sps:$4 sm:$0xff]  }
  0xc7   : > { %v5672_v43 = vld [vmem:[%s7451_s1 + $0x50] ss:$8 sps:$4 sm:$0xff]   ;;  %v5673_v44 = vld [vmem:[%s7451_s1 + $0x64] ss:$8 sps:$4 sm:$0xff]   ;;  %v5675_v47 = vld [vmem:[%s7451_s1 + $0x60] ss:$8 sps:$4 sm:$0xff]  }
  0xc8   : > { %v726_v45 = vld [vmem:[%s6536_s15 + $0x8] sm:$0xff]  ;;  %v727_v46 = vld [vmem:[%s6536_s15 + $0x10] sm:$0xff]  ;;  %v725_v3 = vld [vmem:[%s6536_s15] sm:$0xff]  ;;  %s7502_s10 = sld [smem:[#allocation16_spill]]  ;;  %s7503_s17 = sld [smem:[#allocation19_spill]]  ;;  %vm6202_vm0 = vmmov 0  }
  0xc9   : > { %1410 = vmatpush1.bf16.msra.mxu0 %v5660_v35  ;;  %v4975_v48 = vpack.c.bf16 %v727_v46, %v726_v45  ;;  %v5676_v49 = vld [vmem:[%s7451_s1 + $0x74] ss:$8 sps:$4 sm:$0xff]   ;;  %v5678_v50 = vld [vmem:[%s7451_s1 + $0x70] ss:$8 sps:$4 sm:$0xff]   ;;  %v5679_v51 = vld [vmem:[%s7451_s1 + $0x84] ss:$8 sps:$4 sm:$0xff]   ;;  %v4974_v8 = vpack.c.bf16 %v726_v45, %v725_v3 }
  0xca   : > { %1411 = vmatprep.subr.bf16.mxu0 %v5661_v36  ;;  %v5681_v52 = vld [vmem:[%s7451_s1 + $0x80] ss:$8 sps:$4 sm:$0xff]   ;;  %v5682_v53 = vld [vmem:[%s7451_s1 + $0x94] ss:$8 sps:$4 sm:$0xff]   ;;  %v5684_v54 = vld [vmem:[%s7451_s1 + $0x90] ss:$8 sps:$4 sm:$0xff]  }
  0xcb   : > { %1439 = vmatprep.mubr.bf16.mxu0 %v4975_v48  ;;  %v5685_v55 = vld [vmem:[%s7451_s1 + $0xa4] ss:$8 sps:$4 sm:$0xff]   ;;  %v5687_v56 = vld [vmem:[%s7451_s1 + $0xa0] ss:$8 sps:$4 sm:$0xff]   ;;  %v5688_v57 = vld [vmem:[%s7451_s1 + $0xb4] ss:$8 sps:$4 sm:$0xff]  }
  0xcc   : > { %v5690_v58 = vld [vmem:[%s7451_s1 + $0xb0] ss:$8 sps:$4 sm:$0xff]   ;;  %v5691_v59 = vld [vmem:[%s7451_s1 + $0xc4] ss:$8 sps:$4 sm:$0xff]   ;;  %v5693_v60 = vld [vmem:[%s7451_s1 + $0xc0] ss:$8 sps:$4 sm:$0xff]  }
  0xcd   : > { %1412 = vmatpush1.bf16.msra.mxu0 %v5663_v37  ;;  %v5694_v61 = vld [vmem:[%s7451_s1 + $0xd4] ss:$8 sps:$4 sm:$0xff]   ;;  %v5696_v62 = vld [vmem:[%s7451_s1 + $0xd0] ss:$8 sps:$4 sm:$0xff]   ;;  %v5697_v63 = vld [vmem:[%s7451_s1 + $0xe4] ss:$8 sps:$4 sm:$0xff]  }
  0xce   : > { %1413 = vmatprep.subr.bf16.mxu0 %v5664_v38  ;;  %v5699_v0 = vld [vmem:[%s7451_s1 + $0xe0] ss:$8 sps:$4 sm:$0xff]   ;;  %v5700_v1 = vld [vmem:[%s7451_s1 + $0xf4] ss:$8 sps:$4 sm:$0xff]   ;;  %v5702_v2 = vld [vmem:[%s7451_s1 + $0xf0] ss:$8 sps:$4 sm:$0xff]  }
  0xcf   : > { %v728_v4 = vld [vmem:[%s6536_s15 + $0x18] sm:$0xff]  ;;  %v5705_v5 = vld [vmem:[%s7451_s1 + $0x104] ss:$8 sps:$4 sm:$0xff]   ;;  %v5703_v7 = vld [vmem:[%s7451_s1 + $0x100] ss:$8 sps:$4 sm:$0xff]   ;;  %s7504_s2 = sld [smem:[#allocation17_spill]] }
  0xd0   : > { %v729_v6 = vld [vmem:[%s6536_s15 + $0x20] sm:$0xff]  ;;  %v5708_v9 = vld [vmem:[%s7451_s1 + $0x114] ss:$8 sps:$4 sm:$0xff]   ;;  %v5706_v11 = vld [vmem:[%s7451_s1 + $0x110] ss:$8 sps:$4 sm:$0xff]   ;;  %v6674_v16 = vpack.c.bf16 %v728_v4, %v727_v46  ;;  %s7505_s30 = sld [smem:[#allocation20_spill]] }
  0xd1   : > { %1414 = vmatpush1.bf16.msra.mxu0 %v5666_v39  ;;  %v6660_v10 = vpack.c.bf16 %v729_v6, %v728_v4  ;;  %v5711_v12 = vld [vmem:[%s7451_s1 + $0x124] ss:$8 sps:$4 sm:$0xff]   ;;  %v731_v14 = vld [vmem:[%s6536_s15 + $0x30] sm:$0xff]  ;;  %v5709_v15 = vld [vmem:[%s7451_s1 + $0x120] ss:$8 sps:$4 sm:$0xff]   ;;  %s7506_s16 = sld [smem:[#allocation22_spill]] }
  0xd2   : > { %1415 = vmatprep.subr.bf16.mxu0 %v5667_v40  ;;  %v730_v13 = vld [vmem:[%s6536_s15 + $0x28] sm:$0xff]  ;;  %v5714_v17 = vld [vmem:[%s7451_s1 + $0x134] ss:$8 sps:$4 sm:$0xff]   ;;  %v5712_v19 = vld [vmem:[%s7451_s1 + $0x130] ss:$8 sps:$4 sm:$0xff]   ;;  %p720_p8 = scmp.lt.s32.totalorder %s6299_s21, 1 }
  0xd3   : > { %v6679_v18 = vpack.c.bf16 %v731_v14, %v730_v13  ;;  %v732_v20 = vld [vmem:[%s6536_s15 + $0x38] sm:$0xff]  ;;  %v733_v21 = vld [vmem:[%s6536_s15 + $0x40] sm:$0xff]  ;;  %v6694_v24 = vpack.c.bf16 %v730_v13, %v729_v6  ;;  %v734_v28 = vld [vmem:[%s6536_s15 + $0x48] sm:$0xff]  ;;  %s7508_s9 = sld [smem:[#allocation24_spill]] }
  0xd4   : > { %v5717_v22 = vld [vmem:[%s7451_s1 + $0x144] ss:$8 sps:$4 sm:$0xff]   ;;  %v5715_v23 = vld [vmem:[%s7451_s1 + $0x140] ss:$8 sps:$4 sm:$0xff]   ;;  %v5720_v25 = vld [vmem:[%s7451_s1 + $0x154] ss:$8 sps:$4 sm:$0xff]   ;;  %v6699_v26 = vpack.c.bf16 %v733_v21, %v732_v20  ;;  %v6714_v32 = vpack.c.bf16 %v732_v20, %v731_v14  ;;  %v6734_v40 = vpack.c.bf16 %v734_v28, %v733_v21 }
  0xd5   : > { %1416 = vmatpush1.bf16.msra.mxu0 %v5669_v41  ;;  %v5718_v27 = vld [vmem:[%s7451_s1 + $0x150] ss:$8 sps:$4 sm:$0xff]   ;;  %v5723_v30 = vld [vmem:[%s7451_s1 + $0x164] ss:$8 sps:$4 sm:$0xff]   ;;  %v5721_v31 = vld [vmem:[%s7451_s1 + $0x160] ss:$8 sps:$4 sm:$0xff]  }
  0xd6   : > { %1417 = vmatprep.subr.bf16.mxu0 %v5670_v42  ;;  %v735_v29 = vld [vmem:[%s6536_s15 + $0x50] sm:$0xff]  ;;  %v736_v35 = vld [vmem:[%s6536_s15 + $0x58] sm:$0xff]  ;;  %v737_v36 = vld [vmem:[%s6536_s15 + $0x60] sm:$0xff]  ;;  %s7514_s21 = smov (!%p720_p8, %s6299_s21), 1 }
  0xd7   : > { %v5726_v33 = vld [vmem:[%s7451_s1 + $0x174] ss:$8 sps:$4 sm:$0xff]   ;;  %v6719_v34 = vpack.c.bf16 %v735_v29, %v734_v28  ;;  %v5724_v37 = vld [vmem:[%s7451_s1 + $0x170] ss:$8 sps:$4 sm:$0xff]   ;;  %v5729_v38 = vld [vmem:[%s7451_s1 + $0x184] ss:$8 sps:$4 sm:$0xff]   ;;  %v6739_v42 = vpack.c.bf16 %v737_v36, %v736_v35  ;;  %v6754_v48 = vpack.c.bf16 %v736_v35, %v735_v29 }
  0xd8   : > { %v5727_v39 = vld [vmem:[%s7451_s1 + $0x180] ss:$8 sps:$4 sm:$0xff]   ;;  %v5732_v41 = vld [vmem:[%s7451_s1 + $0x194] ss:$8 sps:$4 sm:$0xff]   ;;  %v5735_v46 = vld [vmem:[%s7451_s1 + $0x1a4] ss:$8 sps:$4 sm:$0xff]  }
  0xd9   : > { %1418 = vmatpush1.bf16.msra.mxu0 %v5672_v43  ;;  %v5730_v43 = vld [vmem:[%s7451_s1 + $0x190] ss:$8 sps:$4 sm:$0xff]   ;;  %v5753_v6 = vld [vmem:[%s7451_s1 + $0x204] ss:$8 sps:$4 sm:$0xff]   ;;  %s4632_s18 = sshll.u32 %s7514_s21, 3 }
  0xda   : > { %1419 = vmatprep.subr.bf16.mxu0 %v5673_v44  ;;  %v738_v44 = vld [vmem:[%s6536_s15 + $0x68] sm:$0xff]  ;;  %v739_v45 = vld [vmem:[%s6536_s15 + $0x70] sm:$0xff]  ;;  %v744_v4 = vld [vmem:[%s6536_s15 + $0x98] sm:$0xff] }
  0xdb   : > { %v5748_v3 = vld [vmem:[%s7451_s1 + $0x1f0] ss:$8 sps:$4 sm:$0xff]   ;;  %v750_v20 = vld [vmem:[%s6536_s15 + $0xc8] sm:$0xff] }
  0xdc   : > { %v748_v14 = vld [vmem:[%s6536_s15 + $0xb8] sm:$0xff]  ;;  %v751_v21 = vld [vmem:[%s6536_s15 + $0xd0] sm:$0xff] }
  0xdd   : > { %1420 = vmatpush1.bf16.msra.mxu0 %v5675_v47  ;;  %v5733_v47 = vld [vmem:[%s7451_s1 + $0x1a0] ss:$8 sps:$4 sm:$0xff]   ;;  %v5754_v35 = vld [vmem:[%s7451_s1 + $0x210] ss:$8 sps:$4 sm:$0xff]  }
  0xde   : > { %1421 = vmatprep.subr.bf16.mxu0 %v5676_v49  ;;  %v5738_v49 = vld [vmem:[%s7451_s1 + $0x1b4] ss:$8 sps:$4 sm:$0xff]  }
  0xe1   : > { %1422 = vmatpush1.bf16.msra.mxu0 %v5678_v50  ;;  %v6759_v50 = vpack.c.bf16 %v739_v45, %v738_v44 }
  0xe2   : > { %1423 = vmatprep.subr.bf16.mxu0 %v5679_v51  ;;  %v740_v51 = vld [vmem:[%s6536_s15 + $0x78] sm:$0xff] }
  0xe5   : > { %1424 = vmatpush1.bf16.msra.mxu0 %v5681_v52  ;;  %v741_v52 = vld [vmem:[%s6536_s15 + $0x80] sm:$0xff] }
  0xe6   : > { %1425 = vmatprep.subr.bf16.mxu0 %v5682_v53  ;;  %v5736_v53 = vld [vmem:[%s7451_s1 + $0x1b0] ss:$8 sps:$4 sm:$0xff]  }
  0xe9   : > { %1426 = vmatpush1.bf16.msra.mxu0 %v5684_v54  ;;  %v5741_v54 = vld [vmem:[%s7451_s1 + $0x1c4] ss:$8 sps:$4 sm:$0xff]  }
  0xea   : > { %1427 = vmatprep.subr.bf16.mxu0 %v5685_v55  ;;  %v5739_v55 = vld [vmem:[%s7451_s1 + $0x1c0] ss:$8 sps:$4 sm:$0xff]  }
  0xed   : > { %1428 = vmatpush1.bf16.msra.mxu0 %v5687_v56  ;;  %v6774_v56 = vpack.c.bf16 %v738_v44, %v737_v36  ;;  %v5757_v36 = vld [vmem:[%s7451_s1 + $0x220] ss:$8 sps:$4 sm:$0xff]   ;;  %v5772_v44 = vld [vmem:[%s7451_s1 + $0x270] ss:$8 sps:$4 sm:$0xff]  }
  0xee   : > { %1429 = vmatprep.subr.bf16.mxu0 %v5688_v57  ;;  %v5744_v57 = vld [vmem:[%s7451_s1 + $0x1d4] ss:$8 sps:$4 sm:$0xff]  }
  0xf1   : > { %1430 = vmatpush1.bf16.msra.mxu0 %v5690_v58  ;;  %v6779_v58 = vpack.c.bf16 %v741_v52, %v740_v51 }
  0xf2   : > { %1431 = vmatprep.subr.bf16.mxu0 %v5691_v59  ;;  %v742_v59 = vld [vmem:[%s6536_s15 + $0x88] sm:$0xff] }
  0xf5   : > { %1432 = vmatpush1.bf16.msra.mxu0 %v5693_v60  ;;  %v743_v60 = vld [vmem:[%s6536_s15 + $0x90] sm:$0xff] }
  0xf6   : > { %1433 = vmatprep.subr.bf16.mxu0 %v5694_v61  ;;  %v5742_v61 = vld [vmem:[%s7451_s1 + $0x1d0] ss:$8 sps:$4 sm:$0xff]  }
  0xf9   : > { %1434 = vmatpush1.bf16.msra.mxu0 %v5696_v62  ;;  %v5747_v62 = vld [vmem:[%s7451_s1 + $0x1e4] ss:$8 sps:$4 sm:$0xff]  }
  0xfa   : > { %1435 = vmatprep.subr.bf16.mxu0 %v5697_v63  ;;  %v5745_v63 = vld [vmem:[%s7451_s1 + $0x1e0] ss:$8 sps:$4 sm:$0xff]  }
  0xfd   : > { %1436 = vmatpush1.bf16.msra.mxu0 %v5699_v0  ;;  %v6794_v0 = vpack.c.bf16 %v740_v51, %v739_v45  ;;  %v5776_v45 = vld [vmem:[%s7453_s3] sm:$0xff]   ;;  %v5779_v51 = vld [vmem:[%s7453_s3 + $0x50] sm:$0xff]  }
  0xfe   : > { %1437 = vmatprep.subr.bf16.mxu0 %v5700_v1  ;;  %v5750_v1 = vld [vmem:[%s7451_s1 + $0x1f4] ss:$8 sps:$4 sm:$0xff]  }
 0x101   : > { %1438 = vmatpush1.bf16.msra.mxu0 %v5702_v2  ;;  %v6799_v2 = vpack.c.bf16 %v743_v60, %v742_v59 }
 0x102   : > { %1580 = vmatprep.subr.bf16.mxu0 %v5705_v5  ;;  %v745_v5 = vld [vmem:[%s6536_s15 + $0xa0] sm:$0xff] }
 0x104   : > { %1440 = vmatmul.mubr.bf16.vlgmr.msra.gmra.mrb[0].mxu0 %v4974_v8  ;;  %v6813_v8 = vpack.c.bf16 %v745_v5, %v744_v4 }
 0x105   : > { %1581 = vmatpush1.bf16.msra.mxu0 %v5703_v7  ;;  %1449 = vmatprep.mubr.bf16.mxu0 %v6660_v10  ;;  %v6811_v7 = vpack.c.bf16 %v742_v59, %v741_v52  ;;  %v5788_v59 = vld [vmem:[%s7453_s3 + $0x30] sm:$0xff]  }
 0x106   : > { %1582 = vmatprep.subr.bf16.mxu0 %v5708_v9  ;;  %v746_v9 = vld [vmem:[%s6536_s15 + $0xa8] sm:$0xff] }
 0x109   : > { %1583 = vmatpush1.bf16.msra.mxu0 %v5706_v11  ;;  %v747_v11 = vld [vmem:[%s6536_s15 + $0xb0] sm:$0xff] }
 0x10a   : > { %1584 = vmatprep.subr.bf16.mxu0 %v5711_v12  ;;  %v6819_v12 = vpack.c.bf16 %v744_v4, %v743_v60  ;;  %v6821_v13 = vpack.c.bf16 %v747_v11, %v746_v9  ;;  %v756_v60 = vld [vmem:[%s6536_s15 + $0xf8] sm:$0xff]  ;;  %v933_v4 = vld [vmem:[%s7502_s10] sm:$0x3]  ;;  %s723_s10 = scalar_lea.vmem %s7508_s9, %s4632_s18 }
 0x10c   : > { %1450 = vmatmul.mubr.bf16.gmra.mrb[4].mxu0 %v6674_v16 }
 0x10d   : > { %1459 = vmatprep.mubr.bf16.mxu0 %v6679_v18  ;;  %1585 = vmatpush1.bf16.msra.mxu0 %v5709_v15  ;;  %v749_v15 = vld [vmem:[%s6536_s15 + $0xc0] sm:$0xff] }
 0x10e   : > { %1586 = vmatprep.subr.bf16.mxu0 %v5714_v17  ;;  %v6827_v17 = vpack.c.bf16 %v746_v9, %v745_v5  ;;  %v6842_v28 = vpack.c.bf16 %v750_v20, %v749_v15 }
 0x111   : > { %1587 = vmatpush1.bf16.msra.mxu0 %v5712_v19  ;;  %v6829_v19 = vpack.c.bf16 %v749_v15, %v748_v14 }
 0x112   : > { %1588 = vmatprep.subr.bf16.mxu0 %v5717_v22  ;;  %v6835_v22 = vpack.c.bf16 %v748_v14, %v747_v11 }
 0x114   : > { %1460 = vmatmul.mubr.bf16.gmra.mrb[8].mxu0 %v6694_v24 }
 0x115   : > { %1469 = vmatprep.mubr.bf16.mxu0 %v6699_v26  ;;  %1589 = vmatpush1.bf16.msra.mxu0 %v5715_v23  ;;  %v4999_v23 = vpack.c.bf16 %v751_v21, %v750_v20 }
 0x116   : > { %1590 = vmatprep.subr.bf16.mxu0 %v5720_v25  ;;  %v752_v25 = vld [vmem:[%s6536_s15 + $0xd8] sm:$0xff] }
 0x119   : > { %1591 = vmatpush1.bf16.msra.mxu0 %v5718_v27  ;;  %v6840_v27 = vld [vmem:[%s6536_s15 + $0xe0] sm:$0xff] }
 0x11a   : > { %1592 = vmatprep.subr.bf16.mxu0 %v5723_v30  ;;  %v5001_v29 = vpack.c.bf16 %v6840_v27, %v752_v25  ;;  %v6846_v30 = vpack.c.bf16 %v752_v25, %v751_v21 }
 0x11c   : > { %1470 = vmatmul.mubr.bf16.gmra.mrb[12].mxu0 %v6714_v32 }
 0x11d   : > { %1479 = vmatprep.mubr.bf16.mxu0 %v6719_v34  ;;  %1593 = vmatpush1.bf16.msra.mxu0 %v5721_v31  ;;  %v5751_v31 = vld [vmem:[%s7451_s1 + $0x200] ss:$8 sps:$4 sm:$0xff]  }
 0x11e   : > { %1594 = vmatprep.subr.bf16.mxu0 %v5726_v33  ;;  %v5756_v33 = vld [vmem:[%s7451_s1 + $0x214] ss:$8 sps:$4 sm:$0xff]  }
 0x121   : > { %1595 = vmatpush1.bf16.msra.mxu0 %v5724_v37  ;;  %v5765_v37 = vld [vmem:[%s7451_s1 + $0x244] ss:$8 sps:$4 sm:$0xff]  }
 0x122   : > { %1596 = vmatprep.subr.bf16.mxu0 %v5729_v38  ;;  %v5763_v38 = vld [vmem:[%s7451_s1 + $0x240] ss:$8 sps:$4 sm:$0xff]  }
 0x124   : > { %1480 = vmatmul.mubr.bf16.gmra.mrb[16].mxu0 %v6734_v40 }
 0x125   : > { %1489 = vmatprep.mubr.bf16.mxu0 %v6739_v42  ;;  %1597 = vmatpush1.bf16.msra.mxu0 %v5727_v39  ;;  %v5766_v39 = vld [vmem:[%s7451_s1 + $0x250] ss:$8 sps:$4 sm:$0xff]  }
 0x126   : > { %1598 = vmatprep.subr.bf16.mxu0 %v5732_v41  ;;  %v5771_v41 = vld [vmem:[%s7451_s1 + $0x264] ss:$8 sps:$4 sm:$0xff]  }
 0x129   : > { %1599 = vmatpush1.bf16.msra.mxu0 %v5730_v43  ;;  %v5769_v43 = vld [vmem:[%s7451_s1 + $0x260] ss:$8 sps:$4 sm:$0xff]  }
 0x12a   : > { %1600 = vmatprep.subr.bf16.mxu0 %v5735_v46  ;;  %v5777_v46 = vld [vmem:[%s7453_s3 + $0x48] sm:$0xff]  }
 0x12c   : > { %1490 = vmatmul.mubr.bf16.gmra.mrb[20].mxu0 %v6754_v48 }
 0x12d   : > { %1499 = vmatprep.mubr.bf16.mxu0 %v6759_v50  ;;  %1601 = vmatpush1.bf16.msra.mxu0 %v5733_v47  ;;  %v754_v47 = vld [vmem:[%s6536_s15 + $0xe8] sm:$0xff] }
 0x12e   : > { %1602 = vmatprep.subr.bf16.mxu0 %v5738_v49  ;;  %v6928_v49 = vld [vmem:[%s6536_s15 + $0xf0] sm:$0xff] }
 0x12f   : > { %v5003_v52 = vpack.c.bf16 %v6928_v49, %v754_v47 }
 0x131   : > { %1603 = vmatpush1.bf16.msra.mxu0 %v5736_v53  ;;  %v5780_v53 = vld [vmem:[%s7453_s3 + $0x10] sm:$0xff]  }
 0x132   : > { %1604 = vmatprep.subr.bf16.mxu0 %v5741_v54  ;;  %v5002_v54 = vpack.c.bf16 %v754_v47, %v6840_v27 }
 0x134   : > { %1500 = vmatmul.mubr.bf16.gmra.mrb[24].mxu0 %v6774_v56 }
 0x135   : > { %1509 = vmatprep.mubr.bf16.mxu0 %v6779_v58  ;;  %1605 = vmatpush1.bf16.msra.mxu0 %v5739_v55  ;;  %v6200_v55 = vmov 0  }
 0x136   : > { %1606 = vmatprep.subr.bf16.mxu0 %v5744_v57  ;;  %v5786_v57 = vld [vmem:[%s7453_s3 + $0x28] sm:$0xff]  }
 0x139   : > { %1607 = vmatpush1.bf16.msra.mxu0 %v5742_v61  ;;  %v5789_v61 = vld [vmem:[%s7453_s3 + $0x78] sm:$0xff]  }
 0x13a   : > { %1608 = vmatprep.subr.bf16.mxu0 %v5747_v62  ;;  %v5790_v62 = vld [vmem:[%s7453_s3 + $0x38] sm:$0xff]  }
 0x13c   : > { %1510 = vmatmul.mubr.bf16.gmra.mrb[28].mxu0 %v6794_v0 }
 0x13d   : > { %1519 = vmatprep.mubr.bf16.mxu0 %v6799_v2  ;;  %1609 = vmatpush1.bf16.msra.mxu0 %v5745_v63  ;;  %v5004_v63 = vpack.c.bf16 %v756_v60, %v6928_v49 }
 0x13e   : > { %1610 = vmatprep.subr.bf16.mxu0 %v5750_v1  ;;  %v935_v1 = vlaneseq }
 0x141   : > { %1611 = vmatpush1.bf16.msra.mxu0 %v5748_v3 }
 0x142   : > { %1753 = vmatprep.subr.bf16.mxu0 %v5753_v6 }
 0x144   : > { %1520 = vmatmul.mubr.bf16.gmra.mrb[32].mxu0 %v6811_v7 }
 0x145   : > { %1529 = vmatprep.mubr.bf16.mxu0 %v6813_v8 }
 0x14c   : > { %1530 = vmatmul.mubr.bf16.gmra.mrb[36].mxu0 %v6819_v12 }
 0x14d   : > { %1539 = vmatprep.mubr.bf16.mxu0 %v6821_v13 }
 0x154   : > { %1540 = vmatmul.mubr.bf16.gmra.mrb[40].mxu0 %v6827_v17 }
 0x155   : > { %1549 = vmatprep.mubr.bf16.mxu0 %v6829_v19 }
 0x15c   : > { %1550 = vmatmul.mubr.bf16.gmra.mrb[44].mxu0 %v6835_v22 }
 0x15d   : > { %1559 = vmatprep.mubr.bf16.mxu0 %v4999_v23 }
 0x164   : > { %1560 = vmatmul.mubr.bf16.gmra.mrb[48].mxu0 %v6842_v28 }
 0x165   : > { %1569 = vmatprep.mubr.bf16.mxu0 %v5001_v29 }
 0x16c   : > { %1570 = vmatmul.mubr.bf16.gmra.mrb[52].mxu0 %v6846_v30 }
 0x16d   : > { %1612 = vmatprep.mubr.bf16.mxu0 %v6660_v10  ;;  %v5759_v10 = vld [vmem:[%s7451_s1 + $0x224] ss:$8 sps:$4 sm:$0xff]  }
 0x174   : > { %1613 = vmatmul.mubr.bf16.vlgmr.msra.gmra.mrb[0].mxu0 %v6674_v16  ;;  %v5762_v16 = vld [vmem:[%s7451_s1 + $0x234] ss:$8 sps:$4 sm:$0xff]  }
 0x175   : > { %1754 = vmatpush1.bf16.msra.mxu0 %v5751_v31  ;;  %1622 = vmatprep.mubr.bf16.mxu0 %v6679_v18  ;;  %v5760_v18 = vld [vmem:[%s7451_s1 + $0x230] ss:$8 sps:$4 sm:$0xff]  }
 0x176   : > { %1755 = vmatprep.subr.bf16.mxu0 %v5756_v33 }
 0x179   : > { %1756 = vmatpush1.bf16.msra.mxu0 %v5754_v35 }
 0x17a   : > { %1757 = vmatprep.subr.bf16.mxu0 %v5759_v10 }
 0x17c   : > { %1623 = vmatmul.mubr.bf16.gmra.mrb[4].mxu0 %v6694_v24 }
 0x17d   : > { %1632 = vmatprep.mubr.bf16.mxu0 %v6699_v26  ;;  %1758 = vmatpush1.bf16.msra.mxu0 %v5757_v36  ;;  %v5768_v26 = vld [vmem:[%s7451_s1 + $0x254] ss:$8 sps:$4 sm:$0xff]  }
 0x17e   : > { %1759 = vmatprep.subr.bf16.mxu0 %v5762_v16 }
 0x181   : > { %1760 = vmatpush1.bf16.msra.mxu0 %v5760_v18 }
 0x182   : > { %1761 = vmatprep.subr.bf16.mxu0 %v5765_v37 }
 0x184   : > { %1633 = vmatmul.mubr.bf16.gmra.mrb[8].mxu0 %v6714_v32 }
 0x185   : > { %1642 = vmatprep.mubr.bf16.mxu0 %v6719_v34  ;;  %1762 = vmatpush1.bf16.msra.mxu0 %v5763_v38  ;;  %v5774_v34 = vld [vmem:[%s7451_s1 + $0x274] ss:$8 sps:$4 sm:$0xff]  }
 0x186   : > { %1763 = vmatprep.subr.bf16.mxu0 %v5768_v26 }
 0x189   : > { %1764 = vmatpush1.bf16.msra.mxu0 %v5766_v39 }
 0x18a   : > { %1765 = vmatprep.subr.bf16.mxu0 %v5771_v41 }
 0x18c   : > { %1643 = vmatmul.mubr.bf16.gmra.mrb[12].mxu0 %v6734_v40 }
 0x18d   : > { %1652 = vmatprep.mubr.bf16.mxu0 %v6739_v42  ;;  %1766 = vmatpush1.bf16.msra.mxu0 %v5769_v43  ;;  %v5775_v42 = vld [vmem:[%s7453_s3 + $0x40] sm:$0xff]  }
 0x18e   : > { %1767 = vmatprep.subr.bf16.mxu0 %v5774_v34  ;;  %5030 = vmatprep.subr.bf16.mxu1 %v5775_v42 }
 0x18f   : > { %5031 = vmatpush3.bf16.msra.mxu1 %v5776_v45 }
 0x190   : > { %5032 = vmatprep.subr.bf16.mxu1 %v5777_v46  ;;  %v5792_v46 = vld [vmem:[%s7454_s4] sm:$0xff]  }
 0x191   : > { %1768 = vmatpush1.bf16.msra.mxu0 %v5772_v44 }
 0x194   : > { %1653 = vmatmul.mubr.bf16.gmra.mrb[16].mxu0 %v6754_v48 }
 0x195   : > { %1662 = vmatprep.mubr.bf16.mxu0 %v6759_v50  ;;  %v5778_v50 = vld [vmem:[%s7453_s3 + $0x8] sm:$0xff]  }
 0x196   : > { %5033 = vmatpush3.bf16.msra.mxu1 %v5778_v50  ;;  %v5793_v50 = vld [vmem:[%s7454_s4 + $0x48] sm:$0xff]  }
 0x197   : > { %5034 = vmatprep.subr.bf16.mxu1 %v5779_v51 }
 0x19a   : > { %5035 = vmatpush3.bf16.msra.mxu1 %v5780_v53 }
 0x19c   : > { %1663 = vmatmul.mubr.bf16.gmra.mrb[20].mxu0 %v6774_v56 }
 0x19d   : > { %1672 = vmatprep.mubr.bf16.mxu0 %v6779_v58  ;;  %v5787_v58 = vld [vmem:[%s7453_s3 + $0x70] sm:$0xff]  }
 0x1a4   : > { %1673 = vmatmul.mubr.bf16.gmra.mrb[24].mxu0 %v6794_v0 }
 0x1a5   : > { %1682 = vmatprep.mubr.bf16.mxu0 %v6799_v2  ;;  %v7003_v2 = vshrl.u32 %v935_v1, 7  ;;  %v5797_v1 = vld [vmem:[%s7454_s4 + $0x58] sm:$0xff]  }
 0x1a7   : > { %v937_v3 = vsub.s32 0, %v7003_v2  ;;  %v941_v5 = vsub.s32 1, %v7003_v2 }
 0x1a9   : > { %v7012_v6 = vrot.slane %v933_v4, %v937_v3 }
 0x1ac   : > { %1683 = vmatmul.mubr.bf16.gmra.mrb[28].mxu0 %v6811_v7 }
 0x1ad   : > { %1692 = vmatprep.mubr.bf16.mxu0 %v6813_v8 }
 0x1b4   : > { %1693 = vmatmul.mubr.bf16.gmra.mrb[32].mxu0 %v6819_v12 }
 0x1b5   : > { %1702 = vmatprep.mubr.bf16.mxu0 %v6821_v13 }
 0x1bc   : > { %1703 = vmatmul.mubr.bf16.gmra.mrb[36].mxu0 %v6827_v17 }
 0x1bd   : > { %1712 = vmatprep.mubr.bf16.mxu0 %v6829_v19 }
 0x1c4   : > { %1713 = vmatmul.mubr.bf16.gmra.mrb[40].mxu0 %v6835_v22 }
 0x1c5   : > { %1722 = vmatprep.mubr.bf16.mxu0 %v4999_v23 }
 0x1cc   : > { %1723 = vmatmul.mubr.bf16.gmra.mrb[44].mxu0 %v6842_v28 }
 0x1cd   : > { %1732 = vmatprep.mubr.bf16.mxu0 %v5001_v29 }
 0x1d4   : > { %1733 = vmatmul.mubr.bf16.gmra.mrb[48].mxu0 %v6846_v30 }
 0x1d5   : > { %1742 = vmatprep.mubr.bf16.mxu0 %v5003_v52 }
 0x1dc   : > { %1743 = vmatmul.mubr.bf16.gmra.mrb[52].mxu0 %v5002_v54 }
 0x1dd   : > { %1785 = vmatprep.mubr.bf16.mxu0 %v6200_v55 }
 0x1e4   : > { %1786 = vmatmul.mubr.bf16.vlgmr.msra.gmra.mrb[0].mxu0 %v6694_v24  ;;  %v5781_v24 = vld [vmem:[%s7453_s3 + $0x58] sm:$0xff]  }
 0x1e5   : > { %1795 = vmatprep.mubr.bf16.mxu0 %v6200_v55  ;;  %5036 = vmatprep.subr.bf16.mxu1 %v5781_v24 }
 0x1ec   : > { %1796 = vmatmul.mubr.bf16.gmra.mrb[4].mxu0 %v6714_v32  ;;  %v5782_v32 = vld [vmem:[%s7453_s3 + $0x18] sm:$0xff]  }
 0x1ed   : > { %1805 = vmatprep.mubr.bf16.mxu0 %v6200_v55  ;;  %5037 = vmatpush3.bf16.msra.mxu1 %v5782_v32  ;;  %v5794_v32 = vld [vmem:[%s7454_s4 + $0x8] sm:$0xff]  }
 0x1f4   : > { %1806 = vmatmul.mubr.bf16.gmra.mrb[8].mxu0 %v6734_v40  ;;  %v5783_v40 = vld [vmem:[%s7453_s3 + $0x60] sm:$0xff]  }
 0x1f5   : > { %1815 = vmatprep.mubr.bf16.mxu0 %v6200_v55  ;;  %5038 = vmatprep.subr.bf16.mxu1 %v5783_v40 }
 0x1fc   : > { %1816 = vmatmul.mubr.bf16.gmra.mrb[12].mxu0 %v6754_v48  ;;  %v5784_v48 = vld [vmem:[%s7453_s3 + $0x20] sm:$0xff]  }
 0x1fd   : > { %1825 = vmatprep.mubr.bf16.mxu0 %v6200_v55  ;;  %5039 = vmatpush3.bf16.msra.mxu1 %v5784_v48  ;;  %v5795_v48 = vld [vmem:[%s7454_s4 + $0x50] sm:$0xff]  }
 0x204   : > { %1826 = vmatmul.mubr.bf16.gmra.mrb[16].mxu0 %v6774_v56  ;;  %v5785_v56 = vld [vmem:[%s7453_s3 + $0x68] sm:$0xff]  }
 0x205   : > { %1835 = vmatprep.mubr.bf16.mxu0 %v6200_v55  ;;  %5040 = vmatprep.subr.bf16.mxu1 %v5785_v56 }
 0x206   : > { %5041 = vmatpush3.bf16.msra.mxu1 %v5786_v57 }
 0x207   : > { %5042 = vmatprep.subr.bf16.mxu1 %v5787_v58 }
 0x20a   : > { %5043 = vmatpush3.bf16.msra.mxu1 %v5788_v59 }
 0x20b   : > { %5044 = vmatprep.subr.bf16.mxu1 %v5789_v61 }
 0x20c   : > { %1836 = vmatmul.mubr.bf16.gmra.mrb[20].mxu0 %v6794_v0  ;;  %v5791_v0 = vld [vmem:[%s7454_s4 + $0x40] sm:$0xff]  }
 0x20d   : > { %1845 = vmatprep.mubr.bf16.mxu0 %v6200_v55 }
 0x20e   : > { %5045 = vmatpush3.bf16.msra.mxu1 %v5790_v62  ;;  %v5796_v62 = vld [vmem:[%s7454_s4 + $0x10] sm:$0xff]  }
 0x20f   : > { %5088 = vmatprep.subr.bf16.mxu1 %v5791_v0 }
 0x214   : > { %1846 = vmatmul.mubr.bf16.gmra.mrb[24].mxu0 %v6811_v7  ;;  %v7016_v7 = vrot.slane %v933_v4, %v941_v5 }
 0x215   : > { %1855 = vmatprep.mubr.bf16.mxu0 %v6200_v55 }
 0x21c   : > { %1856 = vmatmul.mubr.bf16.gmra.mrb[28].mxu0 %v6819_v12 }
 0x21d   : > { %1865 = vmatprep.mubr.bf16.mxu0 %v6200_v55 }
 0x224   : > { %1866 = vmatmul.mubr.bf16.gmra.mrb[32].mxu0 %v6827_v17 }
 0x225   : > { %1875 = vmatprep.mubr.bf16.mxu0 %v6200_v55 }
 0x22c   : > { %1876 = vmatmul.mubr.bf16.gmra.mrb[36].mxu0 %v6835_v22 }
 0x22d   : > { %1885 = vmatprep.mubr.bf16.mxu0 %v6200_v55 }
 0x234   : > { %1886 = vmatmul.mubr.bf16.gmra.mrb[40].mxu0 %v6842_v28 }
 0x235   : > { %1895 = vmatprep.mubr.bf16.mxu0 %v6200_v55 }
 0x23c   : > { %1896 = vmatmul.mubr.bf16.gmra.mrb[44].mxu0 %v6846_v30 }
 0x23d   : > { %1905 = vmatprep.mubr.bf16.mxu0 %v6200_v55 }
 0x244   : > { %1906 = vmatmul.mubr.bf16.gmra.mrb[48].mxu0 %v5002_v54 }
 0x245   : > { %1915 = vmatprep.mubr.bf16.mxu0 %v6200_v55 }
 0x24c   : > { %1916 = vmatmul.mubr.bf16.gmra.mrb[52].mxu0 %v5004_v63 }
 0x2b7   : > { %v1787_v8 = vpop.f32.mrb[0].mxu0 }
 0x2b8   : > { %v5345_v9 = vadd.f32 %v1787_v8, %v7012_v6  ;;  %v1789_v11 = vpop.f32.mrb[1].mxu0 }
 0x2b9   : > { %v5346_v12 = vadd.f32 %v1789_v11, %v7016_v7  ;;  %v1791_v13 = vpop.f32.mrb[2].mxu0 }
 0x2ba   : > { %v5347_v14 = vadd.f32 %v1791_v13, %v7012_v6  ;;  %v1793_v15 = vpop.f32.mrb[3].mxu0  ;;  %v1926_v19 = vmax.f32 %v5345_v9, 0.0  ;;  %v5798_v13 = vld [vmem:[%s7454_s4 + $0x18] sm:$0xff]  }
 0x2bb   : > { %v5348_v17 = vadd.f32 %v1793_v15, %v7016_v7  ;;  %v1927_v21 = vmax.f32 %v5346_v12, 0.0  ;;  %v5799_v15 = vld [vmem:[%s7454_s4 + $0x60] sm:$0xff]  }
 0x2bc   : > { %v1928_v20 = vmax.f32 %v5347_v14, 0.0 }
 0x2bd   : > { %v1929_v22 = vmax.f32 %v5348_v17, 0.0 }
 0x2be   : > { %v1982_v23 = vmax.f32 %v1926_v19, %v1928_v20 }
 0x2bf   : > { %v1983_v25 = vmax.f32 %v1927_v21, %v1929_v22  ;;  %v1797_v27 = vpop.f32.mrb[4].mxu0 }
 0x2c0   : > { %v5349_v28 = vadd.f32 %v1797_v27, %v7012_v6  ;;  %v1799_v29 = vpop.f32.mrb[5].mxu0 }
 0x2c1   : > { %v5350_v30 = vadd.f32 %v1799_v29, %v7016_v7  ;;  %v1801_v31 = vpop.f32.mrb[6].mxu0 }
 0x2c2   : > { %v5351_v33 = vadd.f32 %v1801_v31, %v7012_v6  ;;  %v1803_v35 = vpop.f32.mrb[7].mxu0  ;;  %v1930_v36 = vmax.f32 %v5349_v28, 0.0  ;;  %v5800_v28 = vld [vmem:[%s7454_s4 + $0x20] sm:$0xff]   ;;  %v5801_v31 = vld [vmem:[%s7454_s4 + $0x68] sm:$0xff]  }
 0x2c3   : > { %v5352_v10 = vadd.f32 %v1803_v35, %v7016_v7  ;;  %v1931_v18 = vmax.f32 %v5350_v30, 0.0 }
 0x2c4   : > { %v1932_v16 = vmax.f32 %v5351_v33, 0.0 }
 0x2c5   : > { %v1933_v37 = vmax.f32 %v5352_v10, 0.0 }
 0x2c6   : > { %v1984_v38 = vmax.f32 %v1930_v36, %v1932_v16 }
 0x2c7   : > { %v1985_v26 = vmax.f32 %v1931_v18, %v1933_v37  ;;  %v1807_v39 = vpop.f32.mrb[8].mxu0  ;;  %v5802_v18 = vld [vmem:[%s7454_s4 + $0x28] sm:$0xff]  }
 0x2c8   : > { %v5353_v41 = vadd.f32 %v1807_v39, %v7012_v6  ;;  %v1809_v43 = vpop.f32.mrb[9].mxu0  ;;  %v7027_v34 = vpack.c.bf16 %v1984_v38, %v1982_v23  ;;  %v5803_v38 = vld [vmem:[%s7454_s4 + $0x70] sm:$0xff]  }
 0x2c9   : > { %v5354_v44 = vadd.f32 %v1809_v43, %v7016_v7  ;;  %v1811_v42 = vpop.f32.mrb[10].mxu0  ;;  %v7030_v45 = vpack.c.bf16 %v1985_v26, %v1983_v25 }
 0x2ca   : > { %v5355_v47 = vadd.f32 %v1811_v42, %v7012_v6  ;;  %v1813_v49 = vpop.f32.mrb[11].mxu0  ;;  %v1934_v52 = vmax.f32 %v5353_v41, 0.0 }
 0x2cb   : > { %v5356_v51 = vadd.f32 %v1813_v49, %v7016_v7  ;;  %2282 = vmatprep.mubr.bf16.mxu1 %v7030_v45  ;;  %v1935_v54 = vmax.f32 %v5354_v44, 0.0 }
 0x2cc   : > { %v1936_v53 = vmax.f32 %v5355_v47, 0.0  ;;  %2283 = vmatmul.mubr.bf16.vlgmr.msra.gmra.mrb[0].mxu1 %v7027_v34 }
 0x2cd   : > { %v1937_v24 = vmax.f32 %v5356_v51, 0.0  ;;  %5089 = vmatpush3.bf16.msra.mxu1 %v5792_v46  ;;  %v5804_v46 = vld [vmem:[%s7454_s4 + $0x30] sm:$0xff]  }
 0x2ce   : > { %v1986_v40 = vmax.f32 %v1934_v52, %v1936_v53  ;;  %5090 = vmatprep.subr.bf16.mxu1 %v5793_v50  ;;  %v5805_v50 = vld [vmem:[%s7454_s4 + $0x78] sm:$0xff]  }
 0x2cf   : > { %v1987_v56 = vmax.f32 %v1935_v54, %v1937_v24  ;;  %v1817_v57 = vpop.f32.mrb[12].mxu0 }
 0x2d0   : > { %v5357_v58 = vadd.f32 %v1817_v57, %v7012_v6  ;;  %v1819_v59 = vpop.f32.mrb[13].mxu0 }
 0x2d1   : > { %v5358_v60 = vadd.f32 %v1819_v59, %v7016_v7  ;;  %v1821_v61 = vpop.f32.mrb[14].mxu0  ;;  %5091 = vmatpush3.bf16.msra.mxu1 %v5794_v32  ;;  %v5806_v32 = vld [vmem:[%s7454_s4 + $0x38] sm:$0xff]  }
 0x2d2   : > { %v5359_v63 = vadd.f32 %v1821_v61, %v7012_v6  ;;  %v1823_v0 = vpop.f32.mrb[15].mxu0  ;;  %5092 = vmatprep.subr.bf16.mxu1 %v5795_v48  ;;  %v1938_v8 = vmax.f32 %v5357_v58, 0.0 }
 0x2d3   : > { %v5360_v4 = vadd.f32 %v1823_v0, %v7016_v7  ;;  %v1939_v11 = vmax.f32 %v5358_v60, 0.0 }
 0x2d4   : > { %v1940_v9 = vmax.f32 %v5359_v63, 0.0 }
 0x2d5   : > { %v1941_v12 = vmax.f32 %v5360_v4, 0.0  ;;  %5093 = vmatpush3.bf16.msra.mxu1 %v5796_v62 }
 0x2d6   : > { %v1988_v14 = vmax.f32 %v1938_v8, %v1940_v9  ;;  %5094 = vmatprep.subr.bf16.mxu1 %v5797_v1 }
 0x2d7   : > { %v1989_v17 = vmax.f32 %v1939_v11, %v1941_v12  ;;  %v1827_v19 = vpop.f32.mrb[16].mxu0 }
 0x2d8   : > { %v5361_v20 = vadd.f32 %v1827_v19, %v7012_v6  ;;  %v1829_v21 = vpop.f32.mrb[17].mxu0  ;;  %v7065_v22 = vpack.c.bf16 %v1988_v14, %v1986_v40 }
 0x2d9   : > { %v5362_v23 = vadd.f32 %v1829_v21, %v7016_v7  ;;  %v1831_v25 = vpop.f32.mrb[18].mxu0  ;;  %v7068_v27 = vpack.c.bf16 %v1989_v17, %v1987_v56  ;;  %5095 = vmatpush3.bf16.msra.mxu1 %v5798_v13 }
 0x2da   : > { %v5363_v29 = vadd.f32 %v1831_v25, %v7012_v6  ;;  %v1833_v30 = vpop.f32.mrb[19].mxu0  ;;  %5096 = vmatprep.subr.bf16.mxu1 %v5799_v15  ;;  %v1942_v35 = vmax.f32 %v5361_v20, 0.0 }
 0x2db   : > { %v5364_v33 = vadd.f32 %v1833_v30, %v7016_v7  ;;  %2290 = vmatprep.mubr.bf16.mxu1 %v7068_v27  ;;  %v1943_v36 = vmax.f32 %v5362_v23, 0.0 }
 0x2dc   : > { %v1944_v10 = vmax.f32 %v5363_v29, 0.0  ;;  %2291 = vmatmul.mubr.bf16.gmra.mrb[4].mxu1 %v7065_v22 }
 0x2dd   : > { %v1945_v16 = vmax.f32 %v5364_v33, 0.0  ;;  %5097 = vmatpush3.bf16.msra.mxu1 %v5800_v28 }
 0x2de   : > { %v1990_v37 = vmax.f32 %v1942_v35, %v1944_v10  ;;  %5098 = vmatprep.subr.bf16.mxu1 %v5801_v31 }
 0x2df   : > { %v1991_v26 = vmax.f32 %v1943_v36, %v1945_v16  ;;  %v1837_v39 = vpop.f32.mrb[20].mxu0 }
 0x2e0   : > { %v5365_v41 = vadd.f32 %v1837_v39, %v7012_v6  ;;  %v1839_v43 = vpop.f32.mrb[21].mxu0 }
 0x2e1   : > { %v5366_v44 = vadd.f32 %v1839_v43, %v7016_v7  ;;  %v1841_v42 = vpop.f32.mrb[22].mxu0  ;;  %5099 = vmatpush3.bf16.msra.mxu1 %v5802_v18 }
 0x2e2   : > { %v5367_v47 = vadd.f32 %v1841_v42, %v7012_v6  ;;  %v1843_v49 = vpop.f32.mrb[23].mxu0  ;;  %5100 = vmatprep.subr.bf16.mxu1 %v5803_v38  ;;  %v1946_v52 = vmax.f32 %v5365_v41, 0.0 }
 0x2e3   : > { %v5368_v51 = vadd.f32 %v1843_v49, %v7016_v7  ;;  %v1947_v54 = vmax.f32 %v5366_v44, 0.0 }
 0x2e4   : > { %v1948_v53 = vmax.f32 %v5367_v47, 0.0 }
 0x2e5   : > { %v1949_v24 = vmax.f32 %v5368_v51, 0.0  ;;  %5101 = vmatpush3.bf16.msra.mxu1 %v5804_v46 }
 0x2e6   : > { %v1992_v40 = vmax.f32 %v1946_v52, %v1948_v53  ;;  %5102 = vmatprep.subr.bf16.mxu1 %v5805_v50 }
 0x2e7   : > { %v1993_v48 = vmax.f32 %v1947_v54, %v1949_v24  ;;  %v1847_v56 = vpop.f32.mrb[24].mxu0 }
 0x2e8   : > { %v5369_v57 = vadd.f32 %v1847_v56, %v7012_v6  ;;  %v1849_v58 = vpop.f32.mrb[25].mxu0  ;;  %v7100_v59 = vpack.c.bf16 %v1992_v40, %v1990_v37 }
 0x2e9   : > { %v5370_v60 = vadd.f32 %v1849_v58, %v7016_v7  ;;  %v1851_v61 = vpop.f32.mrb[26].mxu0  ;;  %v7103_v62 = vpack.c.bf16 %v1993_v48, %v1991_v26  ;;  %5103 = vmatpush3.bf16.msra.mxu1 %v5806_v32 }
 0x2ea   : > { %v5371_v63 = vadd.f32 %v1851_v61, %v7012_v6  ;;  %v1853_v0 = vpop.f32.mrb[27].mxu0  ;;  %v1950_v4 = vmax.f32 %v5369_v57, 0.0 }
 0x2eb   : > { %v5372_v1 = vadd.f32 %v1853_v0, %v7016_v7  ;;  %2298 = vmatprep.mubr.bf16.mxu1 %v7103_v62  ;;  %v1951_v9 = vmax.f32 %v5370_v60, 0.0 }
 0x2ec   : > { %v1952_v8 = vmax.f32 %v5371_v63, 0.0  ;;  %2299 = vmatmul.mubr.bf16.gmra.mrb[8].mxu1 %v7100_v59 }
 0x2ed   : > { %v1953_v11 = vmax.f32 %v5372_v1, 0.0 }
 0x2ee   : > { %v1994_v12 = vmax.f32 %v1950_v4, %v1952_v8 }
 0x2ef   : > { %v1995_v13 = vmax.f32 %v1951_v9, %v1953_v11  ;;  %v1857_v14 = vpop.f32.mrb[28].mxu0 }
 0x2f0   : > { %v5373_v15 = vadd.f32 %v1857_v14, %v7012_v6  ;;  %v1859_v17 = vpop.f32.mrb[29].mxu0 }
 0x2f1   : > { %v5374_v19 = vadd.f32 %v1859_v17, %v7016_v7  ;;  %v1861_v20 = vpop.f32.mrb[30].mxu0 }
 0x2f2   : > { %v5375_v21 = vadd.f32 %v1861_v20, %v7012_v6  ;;  %v1863_v23 = vpop.f32.mrb[31].mxu0  ;;  %v1954_v28 = vmax.f32 %v5373_v15, 0.0 }
 0x2f3   : > { %v5376_v25 = vadd.f32 %v1863_v23, %v7016_v7  ;;  %v1955_v30 = vmax.f32 %v5374_v19, 0.0 }
 0x2f4   : > { %v1956_v29 = vmax.f32 %v5375_v21, 0.0 }
 0x2f5   : > { %v1957_v31 = vmax.f32 %v5376_v25, 0.0 }
 0x2f6   : > { %v1996_v33 = vmax.f32 %v1954_v28, %v1956_v29 }
 0x2f7   : > { %v1997_v35 = vmax.f32 %v1955_v30, %v1957_v31  ;;  %v1867_v10 = vpop.f32.mrb[32].mxu0 }
 0x2f8   : > { %v5377_v36 = vadd.f32 %v1867_v10, %v7012_v6  ;;  %v1869_v16 = vpop.f32.mrb[33].mxu0  ;;  %v7114_v18 = vpack.c.bf16 %v1996_v33, %v1994_v12 }
 0x2f9   : > { %v5378_v37 = vadd.f32 %v1869_v16, %v7016_v7  ;;  %v1871_v38 = vpop.f32.mrb[34].mxu0  ;;  %v7117_v26 = vpack.c.bf16 %v1997_v35, %v1995_v13 }
 0x2fa   : > { %v5379_v39 = vadd.f32 %v1871_v38, %v7012_v6  ;;  %v1873_v41 = vpop.f32.mrb[35].mxu0  ;;  %v1958_v44 = vmax.f32 %v5377_v36, 0.0 }
 0x2fb   : > { %v5380_v43 = vadd.f32 %v1873_v41, %v7016_v7  ;;  %2306 = vmatprep.mubr.bf16.mxu1 %v7117_v26  ;;  %v1959_v46 = vmax.f32 %v5378_v37, 0.0 }
 0x2fc   : > { %v1960_v42 = vmax.f32 %v5379_v39, 0.0  ;;  %2307 = vmatmul.mubr.bf16.gmra.mrb[12].mxu1 %v7114_v18 }
 0x2fd   : > { %v1961_v47 = vmax.f32 %v5380_v43, 0.0 }
 0x2fe   : > { %v1998_v49 = vmax.f32 %v1958_v44, %v1960_v42 }
 0x2ff   : > { %v1999_v50 = vmax.f32 %v1959_v46, %v1961_v47  ;;  %v1877_v51 = vpop.f32.mrb[36].mxu0 }
 0x300   : > { %v5381_v52 = vadd.f32 %v1877_v51, %v7012_v6  ;;  %v1879_v53 = vpop.f32.mrb[37].mxu0 }
 0x301   : > { %v5382_v54 = vadd.f32 %v1879_v53, %v7016_v7  ;;  %v1881_v24 = vpop.f32.mrb[38].mxu0 }
 0x302   : > { %v5383_v32 = vadd.f32 %v1881_v24, %v7012_v6  ;;  %v1883_v40 = vpop.f32.mrb[39].mxu0  ;;  %v1962_v56 = vmax.f32 %v5381_v52, 0.0 }
 0x303   : > { %v5384_v48 = vadd.f32 %v1883_v40, %v7016_v7  ;;  %v1963_v58 = vmax.f32 %v5382_v54, 0.0 }
 0x304   : > { %v1964_v57 = vmax.f32 %v5383_v32, 0.0 }
 0x305   : > { %v1965_v60 = vmax.f32 %v5384_v48, 0.0 }
 0x306   : > { %v2000_v61 = vmax.f32 %v1962_v56, %v1964_v57 }
 0x307   : > { %v2001_v63 = vmax.f32 %v1963_v58, %v1965_v60  ;;  %v1887_v0 = vpop.f32.mrb[40].mxu0 }
 0x308   : > { %v5385_v1 = vadd.f32 %v1887_v0, %v7012_v6  ;;  %v1889_v4 = vpop.f32.mrb[41].mxu0  ;;  %v7128_v8 = vpack.c.bf16 %v2000_v61, %v1998_v49 }
 0x309   : > { %v5386_v9 = vadd.f32 %v1889_v4, %v7016_v7  ;;  %v1891_v11 = vpop.f32.mrb[42].mxu0  ;;  %v7131_v12 = vpack.c.bf16 %v2001_v63, %v1999_v50 }
 0x30a   : > { %v5387_v13 = vadd.f32 %v1891_v11, %v7012_v6  ;;  %v1893_v14 = vpop.f32.mrb[43].mxu0  ;;  %v1966_v17 = vmax.f32 %v5385_v1, 0.0 }
 0x30b   : > { %v5388_v15 = vadd.f32 %v1893_v14, %v7016_v7  ;;  %2314 = vmatprep.mubr.bf16.mxu1 %v7131_v12  ;;  %v1967_v20 = vmax.f32 %v5386_v9, 0.0 }
 0x30c   : > { %v1968_v19 = vmax.f32 %v5387_v13, 0.0  ;;  %2315 = vmatmul.mubr.bf16.gmra.mrb[16].mxu1 %v7128_v8 }
 0x30d   : > { %v1969_v21 = vmax.f32 %v5388_v15, 0.0 }
 0x30e   : > { %v2002_v23 = vmax.f32 %v1966_v17, %v1968_v19 }
 0x30f   : > { %v2003_v25 = vmax.f32 %v1967_v20, %v1969_v21  ;;  %v1897_v28 = vpop.f32.mrb[44].mxu0 }
 0x310   : > { %v5389_v29 = vadd.f32 %v1897_v28, %v7012_v6  ;;  %v1899_v30 = vpop.f32.mrb[45].mxu0  ;;  %v5830_v28 = vld [vmem:[#allocation3 + $0x74] ss:$8 sps:$4 sm:$0xff]  }
 0x311   : > { %v5390_v31 = vadd.f32 %v1899_v30, %v7016_v7  ;;  %v1901_v33 = vpop.f32.mrb[46].mxu0  ;;  %v5833_v30 = vld [vmem:[#allocation3 + $0x84] ss:$8 sps:$4 sm:$0xff]  }
 0x312   : > { %v5391_v35 = vadd.f32 %v1901_v33, %v7012_v6  ;;  %v1903_v10 = vpop.f32.mrb[47].mxu0  ;;  %v1970_v16 = vmax.f32 %v5389_v29, 0.0  ;;  %v5828_v29 = vld [vmem:[#allocation3 + $0x70] ss:$8 sps:$4 sm:$0xff]   ;;  %v5836_v33 = vld [vmem:[#allocation3 + $0x94] ss:$8 sps:$4 sm:$0xff]  }
 0x313   : > { %v5392_v36 = vadd.f32 %v1903_v10, %v7016_v7  ;;  %v1971_v38 = vmax.f32 %v5390_v31, 0.0  ;;  %v5831_v31 = vld [vmem:[#allocation3 + $0x80] ss:$8 sps:$4 sm:$0xff]  }
 0x314   : > { %v1972_v37 = vmax.f32 %v5391_v35, 0.0  ;;  %v5834_v35 = vld [vmem:[#allocation3 + $0x90] ss:$8 sps:$4 sm:$0xff]   ;;  %v5837_v10 = vld [vmem:[#allocation3 + $0xa0] ss:$8 sps:$4 sm:$0xff]  }
 0x315   : > { %v1973_v39 = vmax.f32 %v5392_v36, 0.0  ;;  %v5839_v36 = vld [vmem:[#allocation3 + $0xa4] ss:$8 sps:$4 sm:$0xff]  }
 0x316   : > { %v2004_v41 = vmax.f32 %v1970_v16, %v1972_v37  ;;  %v5842_v16 = vld [vmem:[#allocation3 + $0xb4] ss:$8 sps:$4 sm:$0xff]   ;;  %v5840_v37 = vld [vmem:[#allocation3 + $0xb0] ss:$8 sps:$4 sm:$0xff]  }
 0x317   : > { %v2005_v43 = vmax.f32 %v1971_v38, %v1973_v39  ;;  %v1907_v44 = vpop.f32.mrb[48].mxu0  ;;  %v5845_v38 = vld [vmem:[#allocation3 + $0xc4] ss:$8 sps:$4 sm:$0xff]   ;;  %v5843_v39 = vld [vmem:[#allocation3 + $0xc0] ss:$8 sps:$4 sm:$0xff]  }
 0x318   : > { %v5393_v42 = vadd.f32 %v1907_v44, %v7012_v6  ;;  %v1909_v46 = vpop.f32.mrb[49].mxu0  ;;  %v5015_v47 = vpack.c.bf16 %v2004_v41, %v2002_v23  ;;  %v5825_v23 = vld [vmem:[#allocation3 + $0x60] ss:$8 sps:$4 sm:$0xff]   ;;  %v5848_v41 = vld [vmem:[#allocation3 + $0xd4] ss:$8 sps:$4 sm:$0xff]  }
 0x319   : > { %v5394_v49 = vadd.f32 %v1909_v46, %v7016_v7  ;;  %v1911_v50 = vpop.f32.mrb[50].mxu0  ;;  %v5016_v51 = vpack.c.bf16 %v2005_v43, %v2003_v25  ;;  %v5827_v25 = vld [vmem:[#allocation3 + $0x64] ss:$8 sps:$4 sm:$0xff]   ;;  %v5846_v43 = vld [vmem:[#allocation3 + $0xd0] ss:$8 sps:$4 sm:$0xff]  }
 0x31a   : > { %v5395_v52 = vadd.f32 %v1911_v50, %v7012_v6  ;;  %v1913_v53 = vpop.f32.mrb[51].mxu0  ;;  %v1974_v24 = vmax.f32 %v5393_v42, 0.0  ;;  %v5851_v44 = vld [vmem:[#allocation3 + $0xe4] ss:$8 sps:$4 sm:$0xff]   ;;  %v5849_v42 = vld [vmem:[#allocation3 + $0xe0] ss:$8 sps:$4 sm:$0xff]  }
 0x31b   : > { %v5396_v54 = vadd.f32 %v1913_v53, %v7016_v7  ;;  %2322 = vmatprep.mubr.bf16.mxu1 %v5016_v51  ;;  %v1975_v40 = vmax.f32 %v5394_v49, 0.0  ;;  %v5854_v46 = vld [vmem:[#allocation3 + $0xf4] ss:$8 sps:$4 sm:$0xff]   ;;  %v5857_v49 = vld [vmem:[#allocation3 + $0x104] ss:$8 sps:$4 sm:$0xff]  }
 0x31c   : > { %v1976_v32 = vmax.f32 %v5395_v52, 0.0  ;;  %2323 = vmatmul.mubr.bf16.gmra.mrb[20].mxu1 %v5015_v47 }
 0x31d   : > { %v1977_v48 = vmax.f32 %v5396_v54, 0.0 }
 0x31e   : > { %v2006_v56 = vmax.f32 %v1974_v24, %v1976_v32 }
 0x31f   : > { %v2007_v57 = vmax.f32 %v1975_v40, %v1977_v48  ;;  %v1917_v58 = vpop.f32.mrb[52].mxu0 }
 0x320   : > { %v5397_v60 = vadd.f32 %v1917_v58, %v7012_v6  ;;  %v1919_v61 = vpop.f32.mrb[53].mxu0 }
 0x321   : > { %v5398_v63 = vadd.f32 %v1919_v61, %v7016_v7  ;;  %v1921_v0 = vpop.f32.mrb[54].mxu0 }
 0x322   : > { %v5399_v1 = vadd.f32 %v1921_v0, %v7012_v6  ;;  %v1923_v4 = vpop.f32.mrb[55].mxu0  ;;  %v1978_v11 = vmax.f32 %v5397_v60, 0.0  ;;  %v5807_v6 = vld [vmem:[#allocation3] ss:$8 sps:$4 sm:$0xff]  }
 0x323   : > { %v5400_v9 = vadd.f32 %v1923_v4, %v7016_v7  ;;  %v1979_v14 = vmax.f32 %v5398_v63, 0.0  ;;  %v5809_v7 = vld [vmem:[#allocation3 + $0x4] ss:$8 sps:$4 sm:$0xff]  }
 0x324   : > { %v1980_v13 = vmax.f32 %v5399_v1, 0.0  ;;  %3116 = vmatprep.subr.bf16.mxu1 %v5809_v7 }
 0x325   : > { %v1981_v15 = vmax.f32 %v5400_v9, 0.0 }
 0x326   : > { %v2008_v17 = vmax.f32 %v1978_v11, %v1980_v13 }
 0x327   : > { %v2009_v19 = vmax.f32 %v1979_v14, %v1981_v15 }
 0x328   : > { %v5017_v20 = vpack.c.bf16 %v2008_v17, %v2006_v56 }
 0x329   : > { %v5018_v21 = vpack.c.bf16 %v2009_v19, %v2007_v57 }
 0x32b   : > { %2330 = vmatprep.mubr.bf16.mxu1 %v5018_v21 }
 0x32c   : > { %2331 = vmatmul.mubr.bf16.gmra.mrb[24].mxu1 %v5017_v20 }
 0x32d   : > { %2499 = vmatprep.mubr.bf16.mxu1 %v7030_v45  ;;  %v5810_v45 = vld [vmem:[#allocation3 + $0x10] ss:$8 sps:$4 sm:$0xff]  }
 0x334   : > { %2500 = vmatmul.mubr.bf16.vlgmr.msra.gmra.mrb[28].mxu1 %v7027_v34  ;;  %v5812_v34 = vld [vmem:[#allocation3 + $0x14] ss:$8 sps:$4 sm:$0xff]  }
 0x335   : > { %2507 = vmatprep.mubr.bf16.mxu1 %v7068_v27  ;;  %3117 = vmatpush1.bf16.msra.mxu1 %v5807_v6  ;;  %v5815_v27 = vld [vmem:[#allocation3 + $0x24] ss:$8 sps:$4 sm:$0xff]  }
 0x336   : > { %3118 = vmatprep.subr.bf16.mxu1 %v5812_v34 }
 0x339   : > { %3119 = vmatpush1.bf16.msra.mxu1 %v5810_v45 }
 0x33a   : > { %3120 = vmatprep.subr.bf16.mxu1 %v5815_v27 }
 0x33c   : > { %2508 = vmatmul.mubr.bf16.gmra.mrb[32].mxu1 %v7065_v22  ;;  %v5813_v22 = vld [vmem:[#allocation3 + $0x20] ss:$8 sps:$4 sm:$0xff]  }
 0x33d   : > { %2515 = vmatprep.mubr.bf16.mxu1 %v7103_v62  ;;  %3121 = vmatpush1.bf16.msra.mxu1 %v5813_v22  ;;  %v5816_v62 = vld [vmem:[#allocation3 + $0x30] ss:$8 sps:$4 sm:$0xff]  }
 0x344   : > { %2516 = vmatmul.mubr.bf16.gmra.mrb[36].mxu1 %v7100_v59  ;;  %v5818_v59 = vld [vmem:[#allocation3 + $0x34] ss:$8 sps:$4 sm:$0xff]  }
 0x345   : > { %2523 = vmatprep.mubr.bf16.mxu1 %v7117_v26  ;;  %3122 = vmatprep.subr.bf16.mxu1 %v5818_v59  ;;  %v5819_v26 = vld [vmem:[#allocation3 + $0x40] ss:$8 sps:$4 sm:$0xff]  }
 0x346   : > { %3123 = vmatpush1.bf16.msra.mxu1 %v5816_v62 }
 0x34c   : > { %2524 = vmatmul.mubr.bf16.gmra.mrb[40].mxu1 %v7114_v18  ;;  %v5821_v18 = vld [vmem:[#allocation3 + $0x44] ss:$8 sps:$4 sm:$0xff]  }
 0x34d   : > { %2531 = vmatprep.mubr.bf16.mxu1 %v7131_v12  ;;  %3124 = vmatprep.subr.bf16.mxu1 %v5821_v18  ;;  %v5822_v12 = vld [vmem:[#allocation3 + $0x50] ss:$8 sps:$4 sm:$0xff]  }
 0x34e   : > { %3125 = vmatpush1.bf16.msra.mxu1 %v5819_v26 }
 0x354   : > { %2532 = vmatmul.mubr.bf16.gmra.mrb[44].mxu1 %v7128_v8  ;;  %v5824_v8 = vld [vmem:[#allocation3 + $0x54] ss:$8 sps:$4 sm:$0xff]  }
 0x355   : > { %2539 = vmatprep.mubr.bf16.mxu1 %v5016_v51  ;;  %3126 = vmatprep.subr.bf16.mxu1 %v5824_v8 }
 0x356   : > { %3127 = vmatpush1.bf16.msra.mxu1 %v5822_v12 }
 0x357   : > { %3128 = vmatprep.subr.bf16.mxu1 %v5827_v25 }
 0x35a   : > { %3129 = vmatpush1.bf16.msra.mxu1 %v5825_v23 }
 0x35b   : > { %3130 = vmatprep.subr.bf16.mxu1 %v5830_v28 }
 0x35c   : > { %2540 = vmatmul.mubr.bf16.gmra.mrb[48].mxu1 %v5015_v47  ;;  %v5852_v47 = vld [vmem:[#allocation3 + $0xf0] ss:$8 sps:$4 sm:$0xff]  }
 0x35d   : > { %2547 = vmatprep.mubr.bf16.mxu1 %v5018_v21 }
 0x35e   : > { %3131 = vmatpush1.bf16.msra.mxu1 %v5828_v29 }
 0x35f   : > { %3132 = vmatprep.subr.bf16.mxu1 %v5833_v30 }
 0x362   : > { %3133 = vmatpush1.bf16.msra.mxu1 %v5831_v31 }
 0x363   : > { %3134 = vmatprep.subr.bf16.mxu1 %v5836_v33 }
 0x364   : > { %2548 = vmatmul.mubr.bf16.gmra.mrb[52].mxu1 %v5017_v20 }
 0x366   : > { %3135 = vmatpush1.bf16.msra.mxu1 %v5834_v35 }
 0x367   : > { %3136 = vmatprep.subr.bf16.mxu1 %v5839_v36 }
 0x36a   : > { %3137 = vmatpush1.bf16.msra.mxu1 %v5837_v10 }
 0x36b   : > { %3138 = vmatprep.subr.bf16.mxu1 %v5842_v16 }
 0x36e   : > { %3139 = vmatpush1.bf16.msra.mxu1 %v5840_v37 }
 0x36f   : > { %3140 = vmatprep.subr.bf16.mxu1 %v5845_v38 }
 0x372   : > { %3141 = vmatpush1.bf16.msra.mxu1 %v5843_v39 }
 0x373   : > { %3142 = vmatprep.subr.bf16.mxu1 %v5848_v41 }
 0x376   : > { %3143 = vmatpush1.bf16.msra.mxu1 %v5846_v43 }
 0x377   : > { %3144 = vmatprep.subr.bf16.mxu1 %v5851_v44 }
 0x37a   : > { %3145 = vmatpush1.bf16.msra.mxu1 %v5849_v42 }
 0x37b   : > { %3146 = vmatprep.subr.bf16.mxu1 %v5854_v46 }
 0x37e   : > { %3147 = vmatpush1.bf16.msra.mxu1 %v5852_v47 }
 0x37f   : > { %3199 = vmatprep.subr.bf16.mxu1 %v5857_v49 }
 0x39f   : > { %v5046_v50 = vpop.f32.mrb[0].mxu1 }
 0x3a0   : > { %v5047_v51 = vpop.f32.mrb[1].mxu1 }
 0x3a1   : > { %v5048_v52 = vadd.f32 %v5047_v51, %v5046_v50  ;;  %v5049_v53 = vpop.f32.mrb[2].mxu1 }
 0x3a2   : > { %v5050_v54 = vpop.f32.mrb[3].mxu1 }
 0x3a3   : > { %v5051_v24 = vadd.f32 %v5050_v54, %v5049_v53 }
 0x3af   : > { %v5052_v32 = vpop.f32.mrb[4].mxu1 }
 0x3b0   : > { %v5053_v40 = vpop.f32.mrb[5].mxu1 }
 0x3b1   : > { %v5054_v48 = vadd.f32 %v5053_v40, %v5052_v32  ;;  %v5055_v56 = vpop.f32.mrb[6].mxu1 }
 0x3b2   : > { %v5056_v57 = vpop.f32.mrb[7].mxu1 }
 0x3b3   : > { %v5057_v58 = vadd.f32 %v5056_v57, %v5055_v56 }
 0x3bf   : > { %v5058_v60 = vpop.f32.mrb[8].mxu1 }
 0x3c0   : > { %v5059_v61 = vpop.f32.mrb[9].mxu1 }
 0x3c1   : > { %v5060_v63 = vadd.f32 %v5059_v61, %v5058_v60  ;;  %v5061_v0 = vpop.f32.mrb[10].mxu1  ;;  %v5855_v60 = vld [vmem:[#allocation3 + $0x100] ss:$8 sps:$4 sm:$0xff]   ;;  %v5860_v61 = vld [vmem:[#allocation3 + $0x114] ss:$8 sps:$4 sm:$0xff]  }
 0x3c2   : > { %v5062_v1 = vpop.f32.mrb[11].mxu1 }
 0x3c3   : > { %v5063_v4 = vadd.f32 %v5062_v1, %v5061_v0  ;;  %v5858_v1 = vld [vmem:[#allocation3 + $0x110] ss:$8 sps:$4 sm:$0xff]  }
 0x3cf   : > { %v5064_v9 = vpop.f32.mrb[12].mxu1 }
 0x3d0   : > { %v5065_v11 = vpop.f32.mrb[13].mxu1 }
 0x3d1   : > { %v7159_v13 = vadd.f32 %v5065_v11, %v5064_v9  ;;  %v5067_v14 = vpop.f32.mrb[14].mxu1  ;;  %v5863_v11 = vld [vmem:[#allocation3 + $0x124] ss:$8 sps:$4 sm:$0xff]  }
 0x3d2   : > { %v5068_v15 = vpop.f32.mrb[15].mxu1 }
 0x3d3   : > { %v7161_v17 = vadd.f32 %v5068_v15, %v5067_v14 }
 0x3df   : > { %v5070_v19 = vpop.f32.mrb[16].mxu1 }
 0x3e0   : > { %v5071_v20 = vpop.f32.mrb[17].mxu1 }
 0x3e1   : > { %v7163_v21 = vadd.f32 %v5071_v20, %v5070_v19  ;;  %v5073_v6 = vpop.f32.mrb[18].mxu1 }
 0x3e2   : > { %v5074_v7 = vpop.f32.mrb[19].mxu1 }
 0x3e3   : > { %v7165_v34 = vadd.f32 %v5074_v7, %v5073_v6 }
 0x3ef   : > { %v5076_v45 = vpop.f32.mrb[20].mxu1 }
 0x3f0   : > { %v5077_v22 = vpop.f32.mrb[21].mxu1 }
 0x3f1   : > { %v7167_v27 = vadd.f32 %v5077_v22, %v5076_v45  ;;  %v5079_v59 = vpop.f32.mrb[22].mxu1  ;;  %v5861_v45 = vld [vmem:[#allocation3 + $0x120] ss:$8 sps:$4 sm:$0xff]   ;;  %v5866_v22 = vld [vmem:[#allocation3 + $0x134] ss:$8 sps:$4 sm:$0xff]  }
 0x3f2   : > { %v5080_v62 = vpop.f32.mrb[23].mxu1 }
 0x3f3   : > { %v7169_v18 = vadd.f32 %v5080_v62, %v5079_v59 }
 0x3ff   : > { %v5082_v26 = vpop.f32.mrb[24].mxu1 }
 0x400   : > { %v5083_v8 = vpop.f32.mrb[25].mxu1 }
 0x401   : > { %v7171_v12 = vadd.f32 %v5083_v8, %v5082_v26  ;;  %v5085_v23 = vpop.f32.mrb[26].mxu1  ;;  %v5864_v8 = vld [vmem:[#allocation3 + $0x130] ss:$8 sps:$4 sm:$0xff]  }
 0x402   : > { %v5086_v25 = vpop.f32.mrb[27].mxu1 }
 0x403   : > { %v7173_v28 = vadd.f32 %v5086_v25, %v5085_v23 }
 0x407   : > { %v5104_v29 = vpop.f32.mrb[28].mxu1 }
 0x408   : > { %v5105_v30 = vpop.f32.mrb[29].mxu1 }
 0x409   : > { %v5106_v31 = vadd.f32 %v5105_v30, %v5104_v29  ;;  %v5107_v33 = vpop.f32.mrb[30].mxu1 }
 0x40a   : > { %v5108_v35 = vpop.f32.mrb[31].mxu1 }
 0x40b   : > { %v2556_v10 = vmax.f32 %v5048_v52, %v5106_v31  ;;  %v5109_v36 = vadd.f32 %v5108_v35, %v5107_v33 }
 0x40d   : > { %v2557_v16 = vmax.f32 %v5051_v24, %v5109_v36  ;;  %v5867_v36 = vld [vmem:[#allocation3 + $0x140] ss:$8 sps:$4 sm:$0xff]  }
 0x40f   : > { %v2570_v37 = vpack.c.bf16 %v2557_v16, %v2556_v10  ;;  %v5110_v38 = vpop.f32.mrb[32].mxu1  ;;  %v5872_v16 = vld [vmem:[#allocation3 + $0x154] ss:$8 sps:$4 sm:$0xff]  }
 0x410   : > { %v5111_v39 = vpop.f32.mrb[33].mxu1 }
 0x411   : > { %v5112_v41 = vadd.f32 %v5111_v39, %v5110_v38  ;;  %v5113_v43 = vpop.f32.mrb[34].mxu1  ;;  %v2585_v32 = vunpack.c.h.b16 %v2570_v37 }
 0x412   : > { %v5114_v44 = vpop.f32.mrb[35].mxu1 }
 0x413   : > { %v2558_v42 = vmax.f32 %v5054_v48, %v5112_v41  ;;  %v5115_v46 = vadd.f32 %v5114_v44, %v5113_v43  ;;  %v5870_v41 = vld [vmem:[#allocation3 + $0x150] ss:$8 sps:$4 sm:$0xff]  }
 0x415   : > { %v2559_v47 = vmax.f32 %v5057_v58, %v5115_v46 }
 0x417   : > { %v7175_v49 = vpack.c.bf16 %v2559_v47, %v2558_v42  ;;  %v5116_v50 = vpop.f32.mrb[36].mxu1 }
 0x418   : > { %v5117_v51 = vpop.f32.mrb[37].mxu1 }
 0x419   : > { %v5118_v53 = vadd.f32 %v5117_v51, %v5116_v50  ;;  %v5119_v54 = vpop.f32.mrb[38].mxu1  ;;  %v2586_v52 = vunpack.c.l.b16 %v7175_v49  ;;  %v2587_v19 = vunpack.c.h.b16 %v7175_v49 }
 0x41a   : > { %v5120_v40 = vpop.f32.mrb[39].mxu1 }
 0x41b   : > { %v2560_v24 = vmax.f32 %v5060_v63, %v5118_v53  ;;  %v5121_v56 = vadd.f32 %v5120_v40, %v5119_v54  ;;  %v2691_v57 = vpack.c.b16 %v2586_v52, %v2585_v32  ;;  %v5873_v54 = vld [vmem:[#allocation3 + $0x160] ss:$8 sps:$4 sm:$0xff]   ;;  %v5878_v32 = vld [vmem:[#allocation3 + $0x174] ss:$8 sps:$4 sm:$0xff]  }
 0x41d   : > { %v2561_v0 = vmax.f32 %v5063_v4, %v5121_v56  ;;  %3148 = vmatprep.mubr.bf16.mxu1 %v2691_v57  ;;  %v5876_v56 = vld [vmem:[#allocation3 + $0x170] ss:$8 sps:$4 sm:$0xff]  }
 0x41e   : > { %3149 = vmatmul.mubr.bf16.vlgmr.msra.gmra.mrb[56].mxu1 %v2570_v37 }
 0x41f   : > { %v7178_v48 = vpack.c.bf16 %v2561_v0, %v2560_v24  ;;  %3200 = vmatpush1.bf16.msra.mxu1 %v5855_v60  ;;  %v5122_v58 = vpop.f32.mrb[40].mxu1 }
 0x420   : > { %v5123_v9 = vpop.f32.mrb[41].mxu1  ;;  %3201 = vmatprep.subr.bf16.mxu1 %v5860_v61 }
 0x421   : > { %v5124_v14 = vadd.f32 %v5123_v9, %v5122_v58  ;;  %v5125_v15 = vpop.f32.mrb[42].mxu1  ;;  %v2588_v63 = vunpack.c.l.b16 %v7178_v48  ;;  %v2589_v30 = vunpack.c.h.b16 %v7178_v48 }
 0x422   : > { %v5126_v20 = vpop.f32.mrb[43].mxu1 }
 0x423   : > { %v2562_v6 = vmax.f32 %v7159_v13, %v5124_v14  ;;  %v5127_v4 = vadd.f32 %v5126_v20, %v5125_v15  ;;  %3202 = vmatpush1.bf16.msra.mxu1 %v5858_v1  ;;  %v7183_v7 = vpack.c.b16 %v2588_v63, %v2587_v19  ;;  %v5869_v13 = vld [vmem:[#allocation3 + $0x144] ss:$8 sps:$4 sm:$0xff]   ;;  %v5879_v14 = vld [vmem:[#allocation3 + $0x180] ss:$8 sps:$4 sm:$0xff]   ;;  %v5884_v15 = vld [vmem:[#allocation3 + $0x194] ss:$8 sps:$4 sm:$0xff]  }
 0x424   : > { %3203 = vmatprep.subr.bf16.mxu1 %v5863_v11  ;;  %v5882_v20 = vld [vmem:[#allocation3 + $0x190] ss:$8 sps:$4 sm:$0xff]  }
 0x425   : > { %v2563_v59 = vmax.f32 %v7161_v17, %v5127_v4  ;;  %3158 = vmatprep.mubr.bf16.mxu1 %v7183_v7  ;;  %v5890_v4 = vld [vmem:[#allocation3 + $0x1b4] ss:$8 sps:$4 sm:$0xff]  }
 0x426   : > { %3159 = vmatmul.mubr.bf16.gmra.mrb[60].mxu1 %v7175_v49 }
 0x427   : > { %v7188_v62 = vpack.c.bf16 %v2563_v59, %v2562_v6  ;;  %3204 = vmatpush1.bf16.msra.mxu1 %v5861_v45  ;;  %v5128_v26 = vpop.f32.mrb[44].mxu1  ;;  %v5887_v6 = vld [vmem:[#allocation3 + $0x1a4] ss:$8 sps:$4 sm:$0xff]   ;;  %v5888_v45 = vld [vmem:[#allocation3 + $0x1b0] ss:$8 sps:$4 sm:$0xff]  }
 0x428   : > { %v5129_v23 = vpop.f32.mrb[45].mxu1  ;;  %3205 = vmatprep.subr.bf16.mxu1 %v5866_v22  ;;  %v5893_v22 = vld [vmem:[#allocation3 + $0x1c4] ss:$8 sps:$4 sm:$0xff]   ;;  %v5896_v59 = vld [vmem:[#allocation3 + $0x1d4] ss:$8 sps:$4 sm:$0xff]  }
 0x429   : > { %v5130_v25 = vadd.f32 %v5129_v23, %v5128_v26  ;;  %v5131_v29 = vpop.f32.mrb[46].mxu1  ;;  %v2590_v31 = vunpack.c.l.b16 %v7188_v62  ;;  %v2591_v46 = vunpack.c.h.b16 %v7188_v62  ;;  %v5894_v26 = vld [vmem:[#allocation3 + $0x1d0] ss:$8 sps:$4 sm:$0xff]   ;;  %v5902_v23 = vld [vmem:[#allocation3 + $0x1f4] ss:$8 sps:$4 sm:$0xff]  }
 0x42a   : > { %v5132_v33 = vpop.f32.mrb[47].mxu1 }
 0x42b   : > { %v2564_v17 = vmax.f32 %v7163_v21, %v5130_v25  ;;  %v5133_v35 = vadd.f32 %v5132_v33, %v5131_v29  ;;  %3206 = vmatpush1.bf16.msra.mxu1 %v5864_v8  ;;  %v7193_v10 = vpack.c.b16 %v2590_v31, %v2589_v30  ;;  %v5875_v21 = vld [vmem:[#allocation3 + $0x164] ss:$8 sps:$4 sm:$0xff]   ;;  %v5903_v29 = vld [vmem:[#allocation3 + $0x200] ss:$8 sps:$4 sm:$0xff]   ;;  %v5908_v30 = vld [vmem:[#allocation3 + $0x214] ss:$8 sps:$4 sm:$0xff]  }
 0x42c   : > { %3207 = vmatprep.subr.bf16.mxu1 %v5869_v13  ;;  %v5899_v8 = vld [vmem:[#allocation3 + $0x1e4] ss:$8 sps:$4 sm:$0xff]   ;;  %v5900_v13 = vld [vmem:[#allocation3 + $0x1f0] ss:$8 sps:$4 sm:$0xff]  }
 0x42d   : > { %v2565_v37 = vmax.f32 %v7165_v34, %v5133_v35  ;;  %3168 = vmatprep.mubr.bf16.mxu1 %v7193_v10  ;;  %v5905_v25 = vld [vmem:[#allocation3 + $0x204] ss:$8 sps:$4 sm:$0xff]   ;;  %v5906_v31 = vld [vmem:[#allocation3 + $0x210] ss:$8 sps:$4 sm:$0xff]   ;;  %v5914_v35 = vld [vmem:[#allocation3 + $0x234] ss:$8 sps:$4 sm:$0xff]  }
 0x42e   : > { %3169 = vmatmul.mubr.bf16.gmra.mrb[64].mxu1 %v7178_v48  ;;  %v5911_v33 = vld [vmem:[#allocation3 + $0x224] ss:$8 sps:$4 sm:$0xff]  }
 0x42f   : > { %v7198_v38 = vpack.c.bf16 %v2565_v37, %v2564_v17  ;;  %3208 = vmatpush1.bf16.msra.mxu1 %v5867_v36  ;;  %v5134_v39 = vpop.f32.mrb[48].mxu1  ;;  %v5909_v17 = vld [vmem:[#allocation3 + $0x220] ss:$8 sps:$4 sm:$0xff]   ;;  %v5912_v36 = vld [vmem:[#allocation3 + $0x230] ss:$8 sps:$4 sm:$0xff]  }
 0x430   : > { %v5135_v43 = vpop.f32.mrb[49].mxu1  ;;  %3209 = vmatprep.subr.bf16.mxu1 %v5872_v16  ;;  %v5917_v16 = vld [vmem:[#allocation3 + $0x244] ss:$8 sps:$4 sm:$0xff]   ;;  %v5918_v37 = vld [vmem:[#allocation3 + $0x250] ss:$8 sps:$4 sm:$0xff]  }
 0x431   : > { %v5136_v44 = vadd.f32 %v5135_v43, %v5134_v39  ;;  %v5137_v42 = vpop.f32.mrb[50].mxu1  ;;  %v2592_v47 = vunpack.c.l.b16 %v7198_v38  ;;  %v2593_v0 = vunpack.c.h.b16 %v7198_v38  ;;  %v5923_v39 = vld [vmem:[#allocation3 + $0x264] ss:$8 sps:$4 sm:$0xff]  }
 0x432   : > { %v5138_v50 = vpop.f32.mrb[51].mxu1 }
 0x433   : > { %v2566_v34 = vmax.f32 %v7167_v27, %v5136_v44  ;;  %v5139_v51 = vadd.f32 %v5138_v50, %v5137_v42  ;;  %3210 = vmatpush1.bf16.msra.mxu1 %v5870_v41  ;;  %v7203_v53 = vpack.c.b16 %v2592_v47, %v2591_v46  ;;  %v5881_v27 = vld [vmem:[#allocation3 + $0x184] ss:$8 sps:$4 sm:$0xff]   ;;  %v5926_v44 = vld [vmem:[#allocation3 + $0x274] ss:$8 sps:$4 sm:$0xff]   ;;  %v5924_v46 = vld [vmem:[#allocation3 + $0x270] ss:$8 sps:$4 sm:$0xff]  }
 0x434   : > { %3211 = vmatprep.subr.bf16.mxu1 %v5875_v21  ;;  %v5921_v21 = vld [vmem:[#allocation3 + $0x260] ss:$8 sps:$4 sm:$0xff]  }
 0x435   : > { %v2567_v52 = vmax.f32 %v7169_v18, %v5139_v51  ;;  %3178 = vmatprep.mubr.bf16.mxu1 %v7203_v53  ;;  %v5927_v47 = vld [vmem:[#allocation5 + $0x40] sm:$0xff]   ;;  %v5930_v51 = vld [vmem:[#allocation5 + $0x8] sm:$0xff]  }
 0x436   : > { %3179 = vmatmul.mubr.bf16.gmra.mrb[68].mxu1 %v7188_v62  ;;  %v5928_v50 = vld [vmem:[#allocation5] sm:$0xff]  }
 0x437   : > { %v7208_v40 = vpack.c.bf16 %v2567_v52, %v2566_v34  ;;  %3212 = vmatpush1.bf16.msra.mxu1 %v5873_v54  ;;  %v5140_v24 = vpop.f32.mrb[52].mxu1  ;;  %v5929_v34 = vld [vmem:[#allocation5 + $0x48] sm:$0xff]   ;;  %v5932_v54 = vld [vmem:[#allocation5 + $0x10] sm:$0xff]   ;;  %v5934_v52 = vld [vmem:[#allocation5 + $0x18] sm:$0xff]  }
 0x438   : > { %v5141_v57 = vpop.f32.mrb[53].mxu1  ;;  %3213 = vmatprep.subr.bf16.mxu1 %v5878_v32  ;;  %v5933_v32 = vld [vmem:[#allocation5 + $0x58] sm:$0xff]  }
 0x439   : > { %v5142_v60 = vadd.f32 %v5141_v57, %v5140_v24  ;;  %v5143_v61 = vpop.f32.mrb[54].mxu1  ;;  %v2594_v58 = vunpack.c.l.b16 %v7208_v40  ;;  %v2595_v43 = vunpack.c.h.b16 %v7208_v40  ;;  %v5936_v24 = vld [vmem:[#allocation5 + $0x20] sm:$0xff]   ;;  %v5939_v57 = vld [vmem:[#allocation5 + $0x70] sm:$0xff]  }
 0x43a   : > { %v5144_v1 = vpop.f32.mrb[55].mxu1 }
 0x43b   : > { %v2568_v18 = vmax.f32 %v7171_v12, %v5142_v60  ;;  %v5145_v9 = vadd.f32 %v5144_v1, %v5143_v61  ;;  %3214 = vmatpush1.bf16.msra.mxu1 %v5876_v56  ;;  %v2699_v11 = vpack.c.b16 %v2594_v58, %v2593_v0  ;;  %v5885_v12 = vld [vmem:[#allocation3 + $0x1a0] ss:$8 sps:$4 sm:$0xff]   ;;  %v5942_v60 = vld [vmem:[#allocation5 + $0x38] sm:$0xff]   ;;  %v6201_v61 = vmov 0.0   ;;  %v5961_v58 = vld [vmem:[%s7503_s17 + $0x110] sm:$0xff]  }
 0x43c   : > { %3215 = vmatprep.subr.bf16.mxu1 %v5881_v27  ;;  %v5938_v56 = vld [vmem:[#allocation5 + $0x28] sm:$0xff]   ;;  %v5940_v27 = vld [vmem:[#allocation5 + $0x30] sm:$0xff]   ;;  %5285 = vmatprep.subr.bf16.mxu0 %v6201_v61  ;;  %v2678_v1 = vld [vmem:[%s7504_s2] sm:$0x3]  ;;  %s7507_s2 = sld [smem:[#allocation23_spill]] }
 0x43d   : > { %v2569_v19 = vmax.f32 %v7173_v28, %v5145_v9  ;;  %3188 = vmatprep.mubr.bf16.mxu1 %v2699_v11  ;;  %v5891_v28 = vld [vmem:[#allocation3 + $0x1c0] ss:$8 sps:$4 sm:$0xff]   ;;  %v7259_v9 = vrot.slane %v2678_v1, %v941_v5  ;;  %5301 = vmatprep.mubr.msk.bf16.mxu0 %vm6202_vm0, %v6201_v61 }
 0x43e   : > { %3189 = vmatmul.mubr.bf16.gmra.mrb[72].mxu1 %v7198_v38  ;;  %v5960_v0 = vld [vmem:[%s7503_s17 + $0x108] sm:$0xff]  }
 0x43f   : > { %v7215_v63 = vpack.c.bf16 %v2569_v19, %v2568_v18  ;;  %3216 = vmatpush1.bf16.msra.mxu1 %v5879_v14  ;;  %3231 = vmatprep.mubr.bf16.mxu1 %v7183_v7  ;;  %v5897_v7 = vld [vmem:[#allocation3 + $0x1e0] ss:$8 sps:$4 sm:$0xff]   ;;  %v7255_v18 = vrot.slane %v2678_v1, %v937_v3 }
 0x440   : > { %3217 = vmatprep.subr.bf16.mxu1 %v5884_v15 }
 0x441   : > { %v2596_v41 = vunpack.c.l.b16 %v7215_v63 }
 0x443   : > { %3218 = vmatpush1.bf16.msra.mxu1 %v5882_v20  ;;  %v2701_v42 = vpack.c.b16 %v2596_v41, %v2595_v43  ;;  %v5944_v43 = vld [vmem:[#allocation7] sm:$0xff]  }
 0x444   : > { %3219 = vmatprep.subr.bf16.mxu1 %v5887_v6 }
 0x447   : > { %3220 = vmatpush1.bf16.msra.mxu1 %v5885_v12 }
 0x448   : > { %3221 = vmatprep.subr.bf16.mxu1 %v5890_v4 }
 0x44b   : > { %3222 = vmatpush1.bf16.msra.mxu1 %v5888_v45 }
 0x44c   : > { %3223 = vmatprep.subr.bf16.mxu1 %v5893_v22 }
 0x44f   : > { %3224 = vmatpush1.bf16.msra.mxu1 %v5891_v28 }
 0x450   : > { %3225 = vmatprep.subr.bf16.mxu1 %v5896_v59 }
 0x453   : > { %3226 = vmatpush1.bf16.msra.mxu1 %v5894_v26 }
 0x454   : > { %3227 = vmatprep.subr.bf16.mxu1 %v5899_v8 }
 0x457   : > { %3228 = vmatpush1.bf16.msra.mxu1 %v5897_v7 }
 0x458   : > { %3229 = vmatprep.subr.bf16.mxu1 %v5902_v23 }
 0x45b   : > { %3230 = vmatpush1.bf16.msra.mxu1 %v5900_v13 }
 0x45c   : > { %3282 = vmatprep.subr.bf16.mxu1 %v5905_v25 }
 0x45e   : > { %3232 = vmatmul.mubr.bf16.vlgmr.msra.gmra.mrb[56].mxu1 %v7175_v49  ;;  %v5915_v49 = vld [vmem:[#allocation3 + $0x240] ss:$8 sps:$4 sm:$0xff]  }
 0x45f   : > { %3241 = vmatprep.mubr.bf16.mxu1 %v7193_v10  ;;  %3283 = vmatpush1.bf16.msra.mxu1 %v5903_v29  ;;  %v5920_v10 = vld [vmem:[#allocation3 + $0x254] ss:$8 sps:$4 sm:$0xff]  }
 0x460   : > { %3284 = vmatprep.subr.bf16.mxu1 %v5908_v30 }
 0x463   : > { %3285 = vmatpush1.bf16.msra.mxu1 %v5906_v31 }
 0x464   : > { %3286 = vmatprep.subr.bf16.mxu1 %v5911_v33 }
 0x466   : > { %3242 = vmatmul.mubr.bf16.gmra.mrb[60].mxu1 %v7178_v48 }
 0x467   : > { %3251 = vmatprep.mubr.bf16.mxu1 %v7203_v53  ;;  %3287 = vmatpush1.bf16.msra.mxu1 %v5909_v17  ;;  %v5931_v53 = vld [vmem:[#allocation5 + $0x50] sm:$0xff]  }
 0x468   : > { %3288 = vmatprep.subr.bf16.mxu1 %v5914_v35 }
 0x46b   : > { %3289 = vmatpush1.bf16.msra.mxu1 %v5912_v36 }
 0x46c   : > { %3290 = vmatprep.subr.bf16.mxu1 %v5917_v16 }
 0x46e   : > { %3252 = vmatmul.mubr.bf16.gmra.mrb[64].mxu1 %v7188_v62 }
 0x46f   : > { %3261 = vmatprep.mubr.bf16.mxu1 %v2699_v11  ;;  %3291 = vmatpush1.bf16.msra.mxu1 %v5915_v49 }
 0x470   : > { %3292 = vmatprep.subr.bf16.mxu1 %v5920_v10 }
 0x473   : > { %3293 = vmatpush1.bf16.msra.mxu1 %v5918_v37 }
 0x474   : > { %3294 = vmatprep.subr.bf16.mxu1 %v5923_v39 }
 0x476   : > { %3262 = vmatmul.mubr.bf16.gmra.mrb[68].mxu1 %v7198_v38 }
 0x477   : > { %3271 = vmatprep.mubr.bf16.mxu1 %v2701_v42  ;;  %3295 = vmatpush1.bf16.msra.mxu1 %v5921_v21  ;;  %v5945_v42 = vld [vmem:[#allocation7 + $0x48] sm:$0xff]  }
 0x478   : > { %3296 = vmatprep.subr.bf16.mxu1 %v5926_v44 }
 0x47b   : > { %3297 = vmatpush1.bf16.msra.mxu1 %v5924_v46 }
 0x47c   : > { %5146 = vmatprep.subr.bf16.mxu1 %v5927_v47 }
 0x47e   : > { %3272 = vmatmul.mubr.bf16.gmra.mrb[72].mxu1 %v7208_v40 }
 0x47f   : > { %3314 = vmatprep.mubr.bf16.mxu1 %v6200_v55 }
 0x486   : > { %3315 = vmatmul.mubr.bf16.vlgmr.msra.gmra.mrb[56].mxu1 %v7178_v48  ;;  %v5935_v48 = vld [vmem:[#allocation5 + $0x60] sm:$0xff]  }
 0x487   : > { %3324 = vmatprep.mubr.bf16.mxu1 %v6200_v55  ;;  %5147 = vmatpush3.bf16.msra.mxu1 %v5928_v50 }
 0x488   : > { %5148 = vmatprep.subr.bf16.mxu1 %v5929_v34 }
 0x48b   : > { %5149 = vmatpush3.bf16.msra.mxu1 %v5930_v51 }
 0x48c   : > { %5150 = vmatprep.subr.bf16.mxu1 %v5931_v53  ;;  %v5946_v53 = vld [vmem:[#allocation7 + $0x8] sm:$0xff]  }
 0x48e   : > { %3325 = vmatmul.mubr.bf16.gmra.mrb[60].mxu1 %v7188_v62  ;;  %v5937_v62 = vld [vmem:[#allocation5 + $0x68] sm:$0xff]  }
 0x48f   : > { %3334 = vmatprep.mubr.bf16.mxu1 %v6200_v55  ;;  %5151 = vmatpush3.bf16.msra.mxu1 %v5932_v54 }
 0x490   : > { %5152 = vmatprep.subr.bf16.mxu1 %v5933_v32  ;;  %v5947_v32 = vld [vmem:[#allocation7 + $0x50] sm:$0xff]  }
 0x493   : > { %5153 = vmatpush3.bf16.msra.mxu1 %v5934_v52 }
 0x494   : > { %5154 = vmatprep.subr.bf16.mxu1 %v5935_v48 }
 0x496   : > { %3335 = vmatmul.mubr.bf16.gmra.mrb[64].mxu1 %v7198_v38  ;;  %v5941_v38 = vld [vmem:[#allocation5 + $0x78] sm:$0xff]  }
 0x497   : > { %3344 = vmatprep.mubr.bf16.mxu1 %v6200_v55  ;;  %5155 = vmatpush3.bf16.msra.mxu1 %v5936_v24 }
 0x498   : > { %5156 = vmatprep.subr.bf16.mxu1 %v5937_v62 }
 0x49b   : > { %5157 = vmatpush3.bf16.msra.mxu1 %v5938_v56 }
 0x49c   : > { %5158 = vmatprep.subr.bf16.mxu1 %v5939_v57 }
 0x49e   : > { %3345 = vmatmul.mubr.bf16.gmra.mrb[68].mxu1 %v7208_v40  ;;  %v5943_v40 = vld [vmem:[#allocation7 + $0x40] sm:$0xff]  }
 0x49f   : > { %3354 = vmatprep.mubr.bf16.mxu1 %v6200_v55  ;;  %5159 = vmatpush3.bf16.msra.mxu1 %v5940_v27  ;;  %v5959_v55 = vld [vmem:[%s7503_s17 + $0x100] sm:$0xff]   ;;  %v5948_v27 = vld [vmem:[#allocation7 + $0x10] sm:$0xff]  }
 0x4a0   : > { %5160 = vmatprep.subr.bf16.mxu1 %v5941_v38  ;;  %5286 = vmatpush3.bf16.msra.mxu0 %v5959_v55 }
 0x4a1   : > { %5287 = vmatprep.subr.bf16.mxu0 %v6201_v61 }
 0x4a3   : > { %5161 = vmatpush3.bf16.msra.mxu1 %v5942_v60 }
 0x4a4   : > { %5180 = vmatprep.subr.bf16.mxu1 %v5943_v40  ;;  %5288 = vmatpush3.bf16.msra.mxu0 %v5960_v0  ;;  %v5949_v40 = vld [vmem:[#allocation7 + $0x58] sm:$0xff]  }
 0x4a5   : > { %5289 = vmatprep.subr.bf16.mxu0 %v6201_v61 }
 0x4a6   : > { %3355 = vmatmul.mubr.bf16.gmra.mrb[72].mxu1 %v7215_v63 }
 0x4a8   : > { %5290 = vmatpush3.bf16.msra.mxu0 %v5961_v58 }
 0x4a9   : > { %5291 = vmatprep.subr.bf16.mxu0 %v6201_v61 }
 0x559   : > { %v3316_v11 = vpop.f32.mrb[56].mxu1 }
 0x55a   : > { %v5401_v14 = vadd.f32 %v3316_v11, %v7255_v18  ;;  %v3318_v15 = vpop.f32.mrb[57].mxu1 }
 0x55b   : > { %v5402_v19 = vadd.f32 %v3318_v15, %v7259_v9  ;;  %v3320_v63 = vpop.f32.mrb[58].mxu1 }
 0x55c   : > { %v5403_v20 = vadd.f32 %v3320_v63, %v7255_v18  ;;  %v3322_v6 = vpop.f32.mrb[59].mxu1  ;;  %v3365_v4 = vmax.f32 %v5401_v14, 0.0  ;;  %v5950_v14 = vld [vmem:[#allocation7 + $0x18] sm:$0xff]  }
 0x55d   : > { %v5404_v12 = vadd.f32 %v3322_v6, %v7259_v9  ;;  %v3366_v3 = vmax.f32 %v5402_v19, 0.0  ;;  %v5951_v19 = vld [vmem:[#allocation7 + $0x60] sm:$0xff]  }
 0x55e   : > { %v3367_v45 = vmax.f32 %v5403_v20, 0.0 }
 0x55f   : > { %v3368_v22 = vmax.f32 %v5404_v12, 0.0 }
 0x560   : > { %v3385_v28 = vmax.f32 %v3365_v4, %v3367_v45 }
 0x561   : > { %v3386_v2 = vmax.f32 %v3366_v3, %v3368_v22  ;;  %v3326_v5 = vpop.f32.mrb[60].mxu1 }
 0x562   : > { %v5405_v59 = vadd.f32 %v3326_v5, %v7255_v18  ;;  %v3328_v26 = vpop.f32.mrb[61].mxu1 }
 0x563   : > { %v5406_v8 = vadd.f32 %v3328_v26, %v7259_v9  ;;  %v3330_v7 = vpop.f32.mrb[62].mxu1 }
 0x564   : > { %v5407_v23 = vadd.f32 %v3330_v7, %v7255_v18  ;;  %v3332_v13 = vpop.f32.mrb[63].mxu1  ;;  %v3369_v29 = vmax.f32 %v5405_v59, 0.0  ;;  %v5953_v59 = vld [vmem:[#allocation7 + $0x68] sm:$0xff]  }
 0x565   : > { %v5408_v25 = vadd.f32 %v3332_v13, %v7259_v9  ;;  %v3370_v31 = vmax.f32 %v5406_v8, 0.0 }
 0x566   : > { %v3371_v30 = vmax.f32 %v5407_v23, 0.0 }
 0x567   : > { %v3372_v33 = vmax.f32 %v5408_v25, 0.0  ;;  %v5954_v25 = vld [vmem:[#allocation7 + $0x28] sm:$0xff]  }
 0x568   : > { %v3387_v17 = vmax.f32 %v3369_v29, %v3371_v30  ;;  %v5955_v30 = vld [vmem:[#allocation7 + $0x70] sm:$0xff]  }
 0x569   : > { %v3388_v35 = vmax.f32 %v3370_v31, %v3372_v33  ;;  %v3336_v36 = vpop.f32.mrb[64].mxu1 }
 0x56a   : > { %v7269_v16 = vpack.c.bf16 %v3387_v17, %v3385_v28  ;;  %v5409_v49 = vadd.f32 %v3336_v36, %v7255_v18  ;;  %v3338_v10 = vpop.f32.mrb[65].mxu1  ;;  %v5952_v28 = vld [vmem:[#allocation7 + $0x20] sm:$0xff]  }
 0x56b   : > { %v5410_v37 = vadd.f32 %v3338_v10, %v7259_v9  ;;  %v3340_v39 = vpop.f32.mrb[66].mxu1  ;;  %v7273_v41 = vpack.c.bf16 %v3388_v35, %v3386_v2  ;;  %v5957_v35 = vld [vmem:[#allocation7 + $0x78] sm:$0xff]   ;;  %v5962_v36 = vld [vmem:[%s7503_s17 + $0x40] sm:$0xff]  }
 0x56c   : > { %v5411_v21 = vadd.f32 %v3340_v39, %v7255_v18  ;;  %v3342_v44 = vpop.f32.mrb[67].mxu1  ;;  %v3373_v47 = vmax.f32 %v5409_v49, 0.0  ;;  %v5963_v49 = vld [vmem:[%s7503_s17 + $0x118] sm:$0xff]   ;;  %v5964_v10 = vld [vmem:[%s7503_s17] sm:$0xff]   ;;  %v5967_v39 = vld [vmem:[%s7503_s17 + $0x50] sm:$0xff]  }
 0x56d   : > { %v5412_v46 = vadd.f32 %v3342_v44, %v7259_v9  ;;  %3597 = vmatprep.mubr.bf16.mxu1 %v7273_v41  ;;  %v3374_v34 = vmax.f32 %v5410_v37, 0.0  ;;  %5292 = vmatpush3.bf16.msra.mxu0 %v5963_v49  ;;  %v5966_v37 = vld [vmem:[%s7503_s17 + $0x8] sm:$0xff]   ;;  %v5971_v44 = vld [vmem:[%s7503_s17 + $0x120] sm:$0xff]  }
 0x56e   : > { %v3375_v50 = vmax.f32 %v5411_v21, 0.0  ;;  %3598 = vmatmul.mubr.bf16.vlgmr.msra.gmra.mrb[76].mxu1 %v7269_v16  ;;  %5293 = vmatprep.subr.bf16.mxu0 %v6201_v61  ;;  %v5970_v21 = vld [vmem:[%s7503_s17 + $0x18] sm:$0xff]  }
 0x56f   : > { %v3376_v51 = vmax.f32 %v5412_v46, 0.0  ;;  %5181 = vmatpush3.bf16.msra.mxu1 %v5944_v43  ;;  %v5969_v43 = vld [vmem:[%s7503_s17 + $0x58] sm:$0xff]   ;;  %v5973_v46 = vld [vmem:[%s7503_s17 + $0x20] sm:$0xff]  }
 0x570   : > { %v3389_v54 = vmax.f32 %v3373_v47, %v3375_v50  ;;  %5182 = vmatprep.subr.bf16.mxu1 %v5945_v42  ;;  %v5972_v42 = vld [vmem:[%s7503_s17 + $0x60] sm:$0xff]   ;;  %v5974_v47 = vld [vmem:[%s7503_s17 + $0x68] sm:$0xff]  }
 0x571   : > { %v3390_v52 = vmax.f32 %v3374_v34, %v3376_v51  ;;  %v3346_v48 = vpop.f32.mrb[68].mxu1  ;;  %5294 = vmatpush3.bf16.msra.mxu0 %v5971_v44  ;;  %v5975_v50 = vld [vmem:[%s7503_s17 + $0x28] sm:$0xff]   ;;  %v5976_v34 = vld [vmem:[%s7503_s17 + $0x70] sm:$0xff]  }
 0x572   : > { %v5413_v24 = vadd.f32 %v3346_v48, %v7255_v18  ;;  %v3348_v62 = vpop.f32.mrb[69].mxu1  ;;  %5295 = vmatprep.subr.bf16.mxu0 %v6201_v61  ;;  %v5977_v51 = vld [vmem:[%s7503_s17 + $0x30] sm:$0xff]  }
 0x573   : > { %v5414_v56 = vadd.f32 %v3348_v62, %v7259_v9  ;;  %v3350_v57 = vpop.f32.mrb[70].mxu1  ;;  %5183 = vmatpush3.bf16.msra.mxu1 %v5946_v53  ;;  %v5978_v53 = vld [vmem:[%s7503_s17 + $0x78] sm:$0xff]   ;;  %v5985_v48 = vld [vmem:[%s7503_s17 + $0x130] sm:$0xff]  }
 0x574   : > { %v5415_v38 = vadd.f32 %v3350_v57, %v7255_v18  ;;  %v3352_v60 = vpop.f32.mrb[71].mxu1  ;;  %5184 = vmatprep.subr.bf16.mxu1 %v5947_v32  ;;  %v3377_v0 = vmax.f32 %v5413_v24, 0.0  ;;  %v5979_v32 = vld [vmem:[%s7503_s17 + $0x128] sm:$0xff]   ;;  %v5988_v24 = vld [vmem:[%s7503_s17 + $0x138] sm:$0xff]  }
 0x575   : > { %v5416_v55 = vadd.f32 %v3352_v60, %v7259_v9  ;;  %v3378_v1 = vmax.f32 %v5414_v56, 0.0  ;;  %5296 = vmatpush3.bf16.msra.mxu0 %v5979_v32  ;;  %v5999_v32 = vld [vmem:[#allocation8] sm:$0xff]  }
 0x576   : > { %v3379_v58 = vmax.f32 %v5415_v38, 0.0  ;;  %5297 = vmatprep.subr.bf16.mxu0 %v6201_v61 }
 0x577   : > { %v3380_v11 = vmax.f32 %v5416_v55, 0.0  ;;  %5185 = vmatpush3.bf16.msra.mxu1 %v5948_v27 }
 0x578   : > { %v3391_v15 = vmax.f32 %v3377_v0, %v3379_v58  ;;  %5186 = vmatprep.subr.bf16.mxu1 %v5949_v40 }
 0x579   : > { %v3392_v63 = vmax.f32 %v3378_v1, %v3380_v11  ;;  %v3356_v20 = vpop.f32.mrb[72].mxu1  ;;  %5298 = vmatpush3.bf16.msra.mxu0 %v5985_v48  ;;  %v6001_v48 = vld [vmem:[#allocation8 + $0x10] sm:$0xff]  }
 0x57a   : > { %v5417_v6 = vadd.f32 %v3356_v20, %v7255_v18  ;;  %v3358_v12 = vpop.f32.mrb[73].mxu1  ;;  %v5021_v4 = vpack.c.bf16 %v3391_v15, %v3389_v54  ;;  %v5980_v54 = vld [vmem:[%s7503_s17 + $0x38] sm:$0xff]   ;;  %5299 = vmatprep.subr.bf16.mxu0 %v6201_v61 }
 0x57b   : > { %v5418_v45 = vadd.f32 %v3358_v12, %v7259_v9  ;;  %v3360_v3 = vpop.f32.mrb[74].mxu1  ;;  %5187 = vmatpush3.bf16.msra.mxu1 %v5950_v14  ;;  %v5022_v22 = vpack.c.bf16 %v3392_v63, %v3390_v52  ;;  %v5981_v52 = vld [vmem:[%s7503_s17 + $0xc0] sm:$0xff]  }
 0x57c   : > { %v5419_v2 = vadd.f32 %v3360_v3, %v7255_v18  ;;  %v3362_v5 = vpop.f32.mrb[75].mxu1  ;;  %5188 = vmatprep.subr.bf16.mxu1 %v5951_v19  ;;  %v3381_v8 = vmax.f32 %v5417_v6, 0.0  ;;  %v5956_v18 = vld [vmem:[#allocation7 + $0x30] sm:$0xff]  }
 0x57d   : > { %v5420_v26 = vadd.f32 %v3362_v5, %v7259_v9  ;;  %3605 = vmatprep.mubr.bf16.mxu1 %v5022_v22  ;;  %v3382_v23 = vmax.f32 %v5418_v45, 0.0  ;;  %v5958_v9 = vld [vmem:[#allocation7 + $0x38] sm:$0xff]   ;;  %5300 = vmatpush3.bf16.msra.mxu0 %v5988_v24 }
 0x57e   : > { %v3383_v7 = vmax.f32 %v5419_v2, 0.0  ;;  %3606 = vmatmul.mubr.bf16.gmra.mrb[80].mxu1 %v5021_v4  ;;  %5325 = vmatprep.subr.bf16.mxu0 %v6201_v61  ;;  %v6002_v24 = vld [vmem:[#allocation8 + $0x18] sm:$0xff]  }
 0x57f   : > { %v3384_v13 = vmax.f32 %v5420_v26, 0.0  ;;  %5189 = vmatpush3.bf16.msra.mxu1 %v5952_v28  ;;  %v5982_v26 = vld [vmem:[%s7503_s17 + $0x80] sm:$0xff]  }
 0x580   : > { %v3393_v29 = vmax.f32 %v3381_v8, %v3383_v7  ;;  %5190 = vmatprep.subr.bf16.mxu1 %v5953_v59 }
 0x581   : > { %v3394_v31 = vmax.f32 %v3382_v23, %v3384_v13  ;;  %v5983_v23 = vld [vmem:[%s7503_s17 + $0xc8] sm:$0xff]  }
 0x582   : > { %v5023_v17 = vpack.c.bf16 %v3393_v29, %v3393_v29 }
 0x583   : > { %v5024_v33 = vpack.c.bf16 %v3394_v31, %v3394_v31  ;;  %5191 = vmatpush3.bf16.msra.mxu1 %v5954_v25 }
 0x584   : > { %5192 = vmatprep.subr.bf16.mxu1 %v5955_v30 }
 0x585   : > { %3613 = vmatprep.mubr.bf16.mxu1 %v5024_v33 }
 0x586   : > { %3614 = vmatmul.mubr.bf16.gmra.mrb[84].mxu1 %v5023_v17 }
 0x587   : > { %5193 = vmatpush3.bf16.msra.mxu1 %v5956_v18  ;;  %3781 = vmatprep.mubr.bf16.mxu1 %v7273_v41  ;;  %v5968_v41 = vld [vmem:[%s7503_s17 + $0x10] sm:$0xff]  }
 0x588   : > { %5194 = vmatprep.subr.bf16.mxu1 %v5957_v35  ;;  %v5986_v18 = vld [vmem:[%s7503_s17 + $0xd0] sm:$0xff]  }
 0x58b   : > { %5195 = vmatpush3.bf16.msra.mxu1 %v5958_v9 }
 0x58c   : > { %5214 = vmatprep.subr.bf16.mxu1 %v5962_v36  ;;  %v5987_v36 = vld [vmem:[%s7503_s17 + $0x90] sm:$0xff]  }
 0x58e   : > { %3782 = vmatmul.mubr.bf16.vlgmr.msra.gmra.mrb[88].mxu1 %v7269_v16  ;;  %v5965_v16 = vld [vmem:[%s7503_s17 + $0x48] sm:$0xff]  }
 0x58f   : > { %3789 = vmatprep.mubr.bf16.mxu1 %v5022_v22  ;;  %5215 = vmatpush3.bf16.msra.mxu1 %v5964_v10  ;;  %v5989_v10 = vld [vmem:[%s7503_s17 + $0xd8] sm:$0xff]  }
 0x590   : > { %5216 = vmatprep.subr.bf16.mxu1 %v5965_v16 }
 0x593   : > { %5217 = vmatpush3.bf16.msra.mxu1 %v5966_v37 }
 0x594   : > { %5218 = vmatprep.subr.bf16.mxu1 %v5967_v39 }
 0x596   : > { %3790 = vmatmul.mubr.bf16.gmra.mrb[92].mxu1 %v5021_v4 }
 0x597   : > { %3797 = vmatprep.mubr.bf16.mxu1 %v5024_v33  ;;  %5219 = vmatpush3.bf16.msra.mxu1 %v5968_v41  ;;  %v5984_v33 = vld [vmem:[%s7503_s17 + $0x88] sm:$0xff]  }
 0x598   : > { %5220 = vmatprep.subr.bf16.mxu1 %v5969_v43  ;;  %v5990_v43 = vld [vmem:[%s7503_s17 + $0x98] sm:$0xff]  }
 0x59b   : > { %5221 = vmatpush3.bf16.msra.mxu1 %v5970_v21  ;;  %v5991_v21 = vld [vmem:[%s7503_s17 + $0xe0] sm:$0xff]  }
 0x59c   : > { %5222 = vmatprep.subr.bf16.mxu1 %v5972_v42  ;;  %v5992_v42 = vld [vmem:[%s7503_s17 + $0xa0] sm:$0xff]  }
 0x59e   : > { %3798 = vmatmul.mubr.bf16.gmra.mrb[96].mxu1 %v5023_v17 }
 0x59f   : > { %5223 = vmatpush3.bf16.msra.mxu1 %v5973_v46  ;;  %v5993_v46 = vld [vmem:[%s7503_s17 + $0xe8] sm:$0xff]  }
 0x5a0   : > { %5224 = vmatprep.subr.bf16.mxu1 %v5974_v47  ;;  %v5994_v47 = vld [vmem:[%s7503_s17 + $0xa8] sm:$0xff]  }
 0x5a3   : > { %5225 = vmatpush3.bf16.msra.mxu1 %v5975_v50  ;;  %v5995_v50 = vld [vmem:[%s7503_s17 + $0xf0] sm:$0xff]  }
 0x5a4   : > { %5226 = vmatprep.subr.bf16.mxu1 %v5976_v34  ;;  %v5996_v34 = vld [vmem:[%s7503_s17 + $0xb0] sm:$0xff]  }
 0x5a7   : > { %5227 = vmatpush3.bf16.msra.mxu1 %v5977_v51  ;;  %v5997_v51 = vld [vmem:[%s7503_s17 + $0xf8] sm:$0xff]  }
 0x5a8   : > { %5228 = vmatprep.subr.bf16.mxu1 %v5978_v53  ;;  %v5998_v53 = vld [vmem:[%s7503_s17 + $0xb8] sm:$0xff]  }
 0x5ab   : > { %5229 = vmatpush3.bf16.msra.mxu1 %v5980_v54 }
 0x5ac   : > { %5236 = vmatprep.subr.bf16.mxu1 %v5981_v52  ;;  %v6000_v52 = vld [vmem:[#allocation8 + $0x8] sm:$0xff]  }
 0x641   : > { %v5162_v62 = vpop.f32.mrb[76].mxu1 }
 0x642   : > { %v5163_v56 = vpop.f32.mrb[77].mxu1 }
 0x643   : > { %v5164_v57 = vadd.f32 %v5163_v56, %v5162_v62  ;;  %v5165_v27 = vpop.f32.mrb[78].mxu1  ;;  %v6003_v62 = vld [vmem:[#allocation8 + $0x20] sm:$0xff]   ;;  %v6004_v56 = vld [vmem:[#allocation8 + $0x28] sm:$0xff]  }
 0x644   : > { %v5166_v38 = vpop.f32.mrb[79].mxu1 }
 0x645   : > { %v5167_v60 = vadd.f32 %v5166_v38, %v5165_v27  ;;  %v6006_v27 = vld [vmem:[#allocation8 + $0x38] sm:$0xff]   ;;  %v6007_v38 = vld [vmem:[#allocation10] sm:$0xff]  }
 0x651   : > { %v5168_v40 = vpop.f32.mrb[80].mxu1 }
 0x652   : > { %v5169_v55 = vpop.f32.mrb[81].mxu1 }
 0x653   : > { %v5170_v0 = vadd.f32 %v5169_v55, %v5168_v40  ;;  %v5171_v58 = vpop.f32.mrb[82].mxu1  ;;  %v6009_v40 = vld [vmem:[#allocation10 + $0x10] sm:$0xff]   ;;  %v6010_v55 = vld [vmem:[#allocation10 + $0x18] sm:$0xff]  }
 0x654   : > { %v5172_v1 = vpop.f32.mrb[83].mxu1 }
 0x655   : > { %v5173_v11 = vadd.f32 %v5172_v1, %v5171_v58  ;;  %v6012_v58 = vld [vmem:[#allocation10 + $0x28] sm:$0xff]  }
 0x659   : > { %v5174_v14 = vpop.f32.mrb[84].mxu1 }
 0x65a   : > { %v5175_v15 = vpop.f32.mrb[85].mxu1 }
 0x65b   : > { %v5176_v19 = vadd.f32 %v5175_v15, %v5174_v14  ;;  %v5177_v63 = vpop.f32.mrb[86].mxu1 }
 0x65c   : > { %v5178_v20 = vpop.f32.mrb[87].mxu1 }
 0x661   : > { %v5196_v6 = vpop.f32.mrb[88].mxu1 }
 0x662   : > { %v5197_v12 = vpop.f32.mrb[89].mxu1 }
 0x663   : > { %v5198_v4 = vadd.f32 %v5197_v12, %v5196_v6  ;;  %v5199_v45 = vpop.f32.mrb[90].mxu1 }
 0x664   : > { %v5200_v3 = vpop.f32.mrb[91].mxu1 }
 0x665   : > { %v3805_v22 = vmax.f32 %v5164_v57, %v5198_v4  ;;  %v5201_v28 = vadd.f32 %v5200_v3, %v5199_v45  ;;  %v6005_v57 = vld [vmem:[#allocation8 + $0x30] sm:$0xff]   ;;  %v4913_v4 = vld [vmem:[%s7505_s30] ss:$0 sm:$0xff] }
 0x667   : > { %v3806_v2 = vmax.f32 %v5167_v60, %v5201_v28  ;;  %v5025_v8 = vpack.c.bf16 %v3805_v22, %v3805_v22  ;;  %v6008_v60 = vld [vmem:[#allocation10 + $0x8] sm:$0xff]  }
 0x669   : > { %v5026_v5 = vpack.c.bf16 %v3806_v2, %v3806_v2  ;;  %v5202_v59 = vpop.f32.mrb[92].mxu1 }
 0x66a   : > { %v5203_v7 = vpop.f32.mrb[93].mxu1 }
 0x66b   : > { %v5204_v13 = vadd.f32 %v5203_v7, %v5202_v59  ;;  %v5205_v25 = vpop.f32.mrb[94].mxu1  ;;  %4190 = vmatprep.mubr.bf16.mxu1 %v5026_v5 }
 0x66c   : > { %v5206_v29 = vpop.f32.mrb[95].mxu1  ;;  %4191 = vmatmul.mubr.bf16.vlgmr.msra.gmra.mrb[100].mxu1 %v5025_v8 }
 0x66d   : > { %v3807_v30 = vmax.f32 %v5170_v0, %v5204_v13  ;;  %v5207_v31 = vadd.f32 %v5206_v29, %v5205_v25  ;;  %5237 = vmatpush3.bf16.msra.mxu1 %v5982_v26  ;;  %v6011_v0 = vld [vmem:[#allocation10 + $0x20] sm:$0xff]   ;;  %v6014_v13 = vld [vmem:[#allocation10 + $0x38] sm:$0xff]  }
 0x66e   : > { %5238 = vmatprep.subr.bf16.mxu1 %v5983_v23  ;;  %v6013_v23 = vld [vmem:[#allocation10 + $0x30] sm:$0xff]   ;;  %v4954_v25 = vld [vmem:[%s7506_s16] ss:$0 sm:$0xff] }
 0x66f   : > { %v3808_v17 = vmax.f32 %v5173_v11, %v5207_v31  ;;  %v5027_v54 = vpack.c.bf16 %v3807_v30, %v3807_v30 }
 0x671   : > { %v5028_v35 = vpack.c.bf16 %v3808_v17, %v3808_v17  ;;  %5239 = vmatpush3.bf16.msra.mxu1 %v5984_v33  ;;  %v5208_v9 = vpop.f32.mrb[96].mxu1 }
 0x672   : > { %v5209_v49 = vpop.f32.mrb[97].mxu1  ;;  %5240 = vmatprep.subr.bf16.mxu1 %v5986_v18 }
 0x673   : > { %v5210_v16 = vadd.f32 %v5209_v49, %v5208_v9  ;;  %v5211_v37 = vpop.f32.mrb[98].mxu1  ;;  %4230 = vmatprep.mubr.bf16.mxu1 %v5028_v35 }
 0x674   : > { %v5212_v39 = vpop.f32.mrb[99].mxu1 }
 0x675   : > { %v3809_v41 = vmax.f32 %v5176_v19, %v5210_v16  ;;  %5241 = vmatpush3.bf16.msra.mxu1 %v5987_v36 }
 0x676   : > { %5242 = vmatprep.subr.bf16.mxu1 %v5989_v10 }
 0x677   : > { %v5029_v44 = vpack.c.bf16 %v3809_v41, %v3809_v41 }
 0x679   : > { %5243 = vmatpush3.bf16.msra.mxu1 %v5990_v43  ;;  %5302 = vmatmul.mubr.bf16.vlgmr.msra.gmra.mrb[56].mxu0 %v5029_v44 }
 0x67a   : > { %5244 = vmatprep.subr.bf16.mxu1 %v5991_v21  ;;  %5341 = vmatprep.mubr.msk.bf16.mxu0 %vm6202_vm0, %v6201_v61 }
 0x67b   : > { %5326 = vmatpush3.bf16.msra.mxu0 %v6007_v38 }
 0x67c   : > { %5327 = vmatprep.subr.bf16.mxu0 %v6201_v61 }
 0x67d   : > { %5245 = vmatpush3.bf16.msra.mxu1 %v5992_v42 }
 0x67e   : > { %5246 = vmatprep.subr.bf16.mxu1 %v5993_v46 }
 0x67f   : > { %5328 = vmatpush3.bf16.msra.mxu0 %v6008_v60 }
 0x680   : > { %5329 = vmatprep.subr.bf16.mxu0 %v6201_v61 }
 0x681   : > { %5247 = vmatpush3.bf16.msra.mxu1 %v5994_v47 }
 0x682   : > { %5248 = vmatprep.subr.bf16.mxu1 %v5995_v50 }
 0x683   : > { %5330 = vmatpush3.bf16.msra.mxu0 %v6009_v40 }
 0x684   : > { %5331 = vmatprep.subr.bf16.mxu0 %v6201_v61 }
 0x685   : > { %5249 = vmatpush3.bf16.msra.mxu1 %v5996_v34 }
 0x686   : > { %5250 = vmatprep.subr.bf16.mxu1 %v5997_v51 }
 0x687   : > { %5332 = vmatpush3.bf16.msra.mxu0 %v6010_v55 }
 0x688   : > { %5333 = vmatprep.subr.bf16.mxu0 %v6201_v61 }
 0x689   : > { %5251 = vmatpush3.bf16.msra.mxu1 %v5998_v53 }
 0x68a   : > { %5305 = vmatprep.subr.bf16.mxu1 %v6201_v61 }
 0x68b   : > { %5334 = vmatpush3.bf16.msra.mxu0 %v6011_v0 }
 0x68c   : > { %4231 = vmatmul.mubr.bf16.vlgmr.msra.gmra.mrb[104].mxu1 %v5027_v54  ;;  %5335 = vmatprep.subr.bf16.mxu0 %v6201_v61 }
 0x68d   : > { %5321 = vmatprep.mubr.msk.bf16.mxu1 %vm6202_vm0, %v6201_v61  ;;  %5306 = vmatpush3.bf16.msra.mxu1 %v5999_v32 }
 0x68e   : > { %5307 = vmatprep.subr.bf16.mxu1 %v6201_v61 }
 0x68f   : > { %5336 = vmatpush3.bf16.msra.mxu0 %v6012_v58 }
 0x690   : > { %5337 = vmatprep.subr.bf16.mxu0 %v6201_v61 }
 0x691   : > { %5308 = vmatpush3.bf16.msra.mxu1 %v6000_v52 }
 0x692   : > { %5309 = vmatprep.subr.bf16.mxu1 %v6201_v61 }
 0x693   : > { %5338 = vmatpush3.bf16.msra.mxu0 %v6013_v23 }
 0x694   : > { %5339 = vmatprep.subr.bf16.mxu0 %v6201_v61 }
 0x695   : > { %5310 = vmatpush3.bf16.msra.mxu1 %v6001_v48 }
 0x696   : > { %5311 = vmatprep.subr.bf16.mxu1 %v6201_v61 }
 0x697   : > { %5340 = vmatpush3.bf16.msra.mxu0 %v6014_v13 }
 0x699   : > { %5312 = vmatpush3.bf16.msra.mxu1 %v6002_v24 }
 0x69a   : > { %5313 = vmatprep.subr.bf16.mxu1 %v6201_v61 }
 0x69d   : > { %5314 = vmatpush3.bf16.msra.mxu1 %v6003_v62 }
 0x69e   : > { %5315 = vmatprep.subr.bf16.mxu1 %v6201_v61 }
 0x6a1   : > { %5316 = vmatpush3.bf16.msra.mxu1 %v6004_v56 }
 0x6a2   : > { %5317 = vmatprep.subr.bf16.mxu1 %v6201_v61 }
 0x6a5   : > { %5318 = vmatpush3.bf16.msra.mxu1 %v6005_v57 }
 0x6a6   : > { %5319 = vmatprep.subr.bf16.mxu1 %v6201_v61  ;;  %v4963_v61 = vld [vmem:[%s7507_s2] ss:$0 sm:$0xff] }
 0x6a9   : > { %5320 = vmatpush3.bf16.msra.mxu1 %v6006_v27 }
 0x73f   : > { %v5230_v1 = vpop.f32.mrb[100].mxu1 }
 0x740   : > { %v5231_v11 = vpop.f32.mrb[101].mxu1 }
 0x741   : > { %v5232_v14 = vadd.f32 %v5231_v11, %v5230_v1  ;;  %v5233_v15 = vpop.f32.mrb[102].mxu1 }
 0x742   : > { %v5234_v19 = vpop.f32.mrb[103].mxu1 }
 0x743   : > { %v4193_v22 = vadd.f32 %v5232_v14, %v4913_v4 }
 0x74c   : > { %v4272_v63 = vpop.f32.mrb[56].mxu0 }
 0x74d   : > { %v5303_v20 = vpop.f32.mrb[57].mxu0 }
 0x74e   : > { %v4275_v6 = vpop.f32.mrb[58].mxu0 }
 0x74f   : > { %v5304_v12 = vpop.f32.mrb[59].mxu0 }
 0x75f   : > { %v5252_v45 = vpop.f32.mrb[104].mxu1 }
 0x760   : > { %v5253_v3 = vpop.f32.mrb[105].mxu1 }
 0x761   : > { %v5254_v28 = vadd.f32 %v5253_v3, %v5252_v45  ;;  %v5255_v2 = vpop.f32.mrb[106].mxu1 }
 0x762   : > { %v5256_v5 = vpop.f32.mrb[107].mxu1 }
 0x763   : > { %v4233_v59 = vadd.f32 %v5254_v28, %v4193_v22 }
 0x765   : > { %v4273_v26 = vadd.f32 %v4272_v63, %v4233_v59 }
 0x767   : > { %v4278_v8 = vmax.f32 %v4273_v26, 0.0 }
 0x769   : > { %v4279_v7 = vpack.c.bf16 %v4278_v8, %v4278_v8 }
 0x76b   : > { %5322 = vmatmul.mubr.bf16.vlgmr.msra.gmra.mrb[108].mxu1 %v4279_v7 }
 0x83e   : > { %v4385_v29 = vpop.f32.mrb[108].mxu1 }
 0x83f   : > { %v4386_v30 = vadd.f32 %v4954_v25, %v4385_v29  ;;  %v5323_v31 = vpop.f32.mrb[109].mxu1 }
 0x840   : > { %v4388_v33 = vpop.f32.mrb[110].mxu1 }
 0x841   : > { %v4391_v18 = vmax.f32 %v4386_v30, 0.0  ;;  %v5324_v17 = vpop.f32.mrb[111].mxu1 }
 0x843   : > { %v4392_v35 = vpack.c.bf16 %v4391_v18, %v4391_v18 }
 0x845   : > { %5342 = vmatmul.mubr.bf16.vlgmr.msra.gmra.mrb[60].mxu0 %v4392_v35 }
 0x918   : > { %v4498_v9 = vpop.f32.mrb[60].mxu0 }
 0x919   : > { %v4499_v36 = vadd.f32 %v4963_v61, %v4498_v9  ;;  %v5343_v49 = vpop.f32.mrb[61].mxu0 }
 0x91a   : > { %v4501_v10 = vpop.f32.mrb[62].mxu0 }
 0x91b   : > { %4504 = vst [vmem:[%s723_s10] sm:$0xff] %v4499_v36  ;;  %v5344_v16 = vpop.f32.mrb[63].mxu0 }
 0x91c PF: > { %s7509_s20 = sld [smem:[#allocation14_spill]]  ;;  %s7510_s28 = sld [smem:[#allocation15_spill]] }
 0x91d   : > { %s7511_s18 = smov %s6185_s19 }
 0x922   : > { %p25_p10 = scmp.ge.s32.totalorder %s7509_s20, 4   ;;  %s7512_s19 = smov %s7510_s28 }
 0x924   :  { %27 = sbr.rel (!%p25_p10) target bundleno = 14 (0xe), region = 174 }
 0x92b   :  { %4524 = vsyncpa [#allocation4], 1 }
 0x92c   :  { %4526 = vsyncpa [#allocation4 + $0x1], 1 }
 0x92d   :  { %4527 = vsyncpa [#allocation6], 1 }
 0x92e   :  { %4528 = vsyncpa [#allocation9], 1 }

</bundles_post_ra>
